<compile_context>
chip_gen: v7x
topology: tpu7x:2x2x1
jax: 0.10.0
libtpu: 0.0.40
codegen_flags: <defaults>
</compile_context>

<pallas_src>
import jax
import jax.numpy as jnp
from jax.experimental import pallas as pl
from jax.experimental.pallas import tpu as pltpu

N_IN = 2
N_HID = 10
LANES = 128
SUB = 8                      # sublane granularity for f32


def _mlp_kernel(w1_ref, b1_ref, w2_ref, b2_ref, p_ref, x_ref, o_ref):
    # x_ref : (bm, 256) f32, lane-interleaved (even lanes x0, odd lanes x1).
    # p_ref : (256, 256) f32 constant 0/1 de-interleave permutation.
    # w1_ref: (20,) SMEM, (in, out) row-major -> w1_ref[i * 10 + j].
    # b1_ref: (10,), w2_ref: (10,), b2_ref: (1,)  -- SMEM scalars.
    x01 = x_ref[...]

    # De-interleave on the MXU (idle otherwise).  HIGHEST precision keeps the
    # f32 values exact; the result is two compact (bm, 128) slabs.
    xd = jnp.dot(x01, p_ref[...],
                 preferred_element_type=jnp.float32,
                 precision=jax.lax.Precision.HIGHEST)
    x0 = xd[:, :LANES]
    x1 = xd[:, LANES:]

    # Unrolled f32 VPU FMA chain over the 10 hidden units.  Weights/biases are
    # scalar-broadcast from SMEM; acc is initialized from unit 0 (saves one
    # full-width add vs. zeros+add).
    h = jnp.maximum(x0 * w1_ref[0] + x1 * w1_ref[N_HID] + b1_ref[0], 0.0)
    acc = h * w2_ref[0]
    for j in range(1, N_HID):
        h = jnp.maximum(x0 * w1_ref[j] + x1 * w1_ref[N_HID + j] + b1_ref[j], 0.0)
        acc = acc + h * w2_ref[j]

    o_ref[...] = acc + b2_ref[0]              # output bias, added once


def sum_predikce_forward(x, hidden_w, hidden_b, output_w, output_b,
                         *, block_rows=1024):
    """SumPredikce forward pass as a single Pallas kernel.

    x        : (B, 2) float32
    hidden_w : (10, 2)  -- PyTorch nn.Linear(2, 10).weight layout
    hidden_b : (10,)
    output_w : (1, 10)  -- PyTorch nn.Linear(10, 1).weight layout
    output_b : (1,)
    returns  : (B, 1) float32
    """
    B = x.shape[0]
    assert x.shape[1] == N_IN
    x = x.astype(jnp.float32)

    # Pad batch only to a multiple of 8*128 = 1024 (sublane-aligned slab).
    B_pad = ((B + SUB * LANES - 1) // (SUB * LANES)) * (SUB * LANES)
    rows = B_pad // LANES
    if B_pad != B:
        x = jnp.pad(x, ((0, B_pad - B), (0, 0)))

    # Free (metadata-only) reshape: row r holds elements [128r, 128r+128),
    # features interleaved along lanes.
    x_slab = x.reshape(rows, 2 * LANES)

    # Block sizing: large blocks to amortize per-step overhead, but keep at
    # least 2 blocks when possible so v7x's two TensorCores both get work.
    bm = min(block_rows, rows)
    if rows >= 2 * SUB and pl.cdiv(rows, bm) < 2:
        bm = ((rows // 2) + SUB - 1) // SUB * SUB
    n_blocks = pl.cdiv(rows, bm)

    # Constant de-interleave permutation: column j<128 selects lane 2j (x0),
    # column 128+j selects lane 2j+1 (x1).
    ii = jnp.arange(2 * LANES)[:, None]
    jj = jnp.arange(2 * LANES)[None, :]
    src = jnp.where(jj < LANES, 2 * jj, 2 * (jj - LANES) + 1)
    perm = (ii == src).astype(jnp.float32)

    # Flatten parameters for SMEM (41 scalars).  PyTorch layout is (out, in);
    # transpose the hidden weight so the kernel indexes (in, out) row-major.
    w1_flat = hidden_w.astype(jnp.float32).T.reshape(-1)    # (20,)
    b1_flat = hidden_b.astype(jnp.float32).reshape(-1)      # (10,)
    w2_flat = output_w.astype(jnp.float32).reshape(-1)      # (10,)
    b2_flat = output_b.astype(jnp.float32).reshape(-1)      # (1,)

    smem = pl.BlockSpec(memory_space=pltpu.MemorySpace.SMEM)

    y_slab = pl.pallas_call(
        _mlp_kernel,
        out_shape=jax.ShapeDtypeStruct((rows, LANES), jnp.float32),
        grid=(n_blocks,),
        in_specs=[smem, smem, smem, smem,
                  pl.BlockSpec((2 * LANES, 2 * LANES), lambda i: (0, 0)),
                  pl.BlockSpec((bm, 2 * LANES), lambda i: (i, 0))],
        out_specs=pl.BlockSpec((bm, LANES), lambda i: (i, 0)),
        compiler_params=pltpu.CompilerParams(
            dimension_semantics=("parallel",),        # megacore sharding (v7x)
            vmem_limit_bytes=32 * 1024 * 1024),
    )(w1_flat, b1_flat, w2_flat, b2_flat, perm, x_slab)

    # Epilogue: reshape is free; the [:B] slice copies only when B was padded.
    # (A fused consumer should take y_slab directly to avoid even that copy.)
    y = y_slab.reshape(B_pad)
    if B_pad != B:
        y = y[:B]
    return y.reshape(B, 1)


def init_params(key):
    """Deterministic init mimicking nn.Linear's uniform(-1/sqrt(fan_in)),
    in PyTorch (out, in) weight layout."""
    k1, k2, k3, k4 = jax.random.split(key, 4)
    bound1 = 1.0 / jnp.sqrt(2.0)     # fan_in = 2
    bound2 = 1.0 / jnp.sqrt(10.0)    # fan_in = 10
    hidden_w = jax.random.uniform(k1, (N_HID, N_IN), jnp.float32, -bound1, bound1)
    hidden_b = jax.random.uniform(k2, (N_HID,), jnp.float32, -bound1, bound1)
    output_w = jax.random.uniform(k3, (1, N_HID), jnp.float32, -bound2, bound2)
    output_b = jax.random.uniform(k4, (1,), jnp.float32, -bound2, bound2)
    return hidden_w, hidden_b, output_w, output_b


if __name__ == "__main__":
    key = jax.random.PRNGKey(0)
    k_params, k_x = jax.random.split(key)

    hidden_w, hidden_b, output_w, output_b = init_params(k_params)

    # Small batch of (a, b) pairs, matching the module's Linear(2, ...) input.
    # B=2500 -> padded to 3072 -> 24 slab rows -> 2 grid blocks (ragged last).
    B = 2500
    x = jax.random.uniform(k_x, (B, 2), jnp.float32, 0.0, 10.0)

    fwd = jax.jit(sum_predikce_forward)
    y = fwd(x, hidden_w, hidden_b, output_w, output_b)
    jax.block_until_ready(y)

    # Reference in plain JAX, written elementwise so it stays exact f32
    # (a default-precision TPU matmul would itself round to bf16).
    w1t = hidden_w.T                                   # (2, 10)
    h_ref = jnp.maximum(x[:, :1] * w1t[0] + x[:, 1:] * w1t[1] + hidden_b, 0.0)
    y_ref = (jnp.sum(h_ref * output_w.reshape(1, -1), axis=1, keepdims=True)
             + output_b)

    assert y.shape == (B, 1)
    assert jnp.allclose(y, y_ref, atol=1e-4, rtol=1e-4)

    print("KERNEL_OK")
</pallas_src>

<mosaic_0001>
module attributes {stable_mosaic.version = 11 : i64} {
  func.func @_mlp_kernel(%arg0: i32, %arg1: memref<20xf32, #tpu.memory_space<smem>>, %arg2: memref<10xf32, #tpu.memory_space<smem>>, %arg3: memref<10xf32, #tpu.memory_space<smem>>, %arg4: memref<1xf32, #tpu.memory_space<smem>>, %arg5: memref<256x256xf32, #tpu.memory_space<vmem>>, %arg6: memref<16x256xf32, #tpu.memory_space<vmem>>, %arg7: memref<16x128xf32, #tpu.memory_space<vmem>>) attributes {dimension_semantics = [#tpu.dimension_semantics<parallel>], iteration_bounds = array<i64: 2>, scalar_prefetch = 0 : i64, scratch_operands = 0 : i64, tpu.core_type = #tpu.core_type<tc>, window_params = [{transform_indices = @transform_0, window_bounds = array<i64: 20>}, {transform_indices = @transform_1, window_bounds = array<i64: 10>}, {transform_indices = @transform_2, window_bounds = array<i64: 10>}, {transform_indices = @transform_3, window_bounds = array<i64: 1>}, {pipeline_mode = #tpu.pipeline_mode<synchronous>, transform_indices = @transform_4, window_bounds = array<i64: 256, 256>}, {transform_indices = @transform_5, window_bounds = array<i64: 16, 256>}, {transform_indices = @transform_6, window_bounds = array<i64: 16, 128>}]} {
    %c0 = arith.constant 0 : index
    %c0_0 = arith.constant 0 : index
    %0 = vector.load %arg6[%c0, %c0_0] : memref<16x256xf32, #tpu.memory_space<vmem>>, vector<16x256xf32>
    %c0_1 = arith.constant 0 : index
    %c0_2 = arith.constant 0 : index
    %1 = vector.load %arg5[%c0_1, %c0_2] : memref<256x256xf32, #tpu.memory_space<vmem>>, vector<256x256xf32>
    %cst = arith.constant dense<0.000000e+00> : vector<16x256xf32>
    %2 = tpu.matmul %0, %1, %cst {dimension_numbers = #tpu.dot_dimension_numbers<[1], [0], [0], [1], [0, 0, 1, 1], [], []>, precision = #tpu.contract_precision<fp32>} : vector<16x256xf32>, vector<256x256xf32>, vector<16x256xf32> -> vector<16x256xf32>
    %3 = vector.extract_strided_slice %2 {offsets = [0, 0], sizes = [16, 128], strides = [1, 1]} : vector<16x256xf32> to vector<16x128xf32>
    %4 = vector.extract_strided_slice %2 {offsets = [0, 128], sizes = [16, 128], strides = [1, 1]} : vector<16x256xf32> to vector<16x128xf32>
    %c0_3 = arith.constant 0 : index
    %5 = memref.load %arg1[%c0_3] : memref<20xf32, #tpu.memory_space<smem>>
    %6 = vector.broadcast %5 : f32 to vector<16x128xf32>
    %7 = arith.mulf %3, %6 : vector<16x128xf32>
    %c10 = arith.constant 10 : index
    %8 = memref.load %arg1[%c10] : memref<20xf32, #tpu.memory_space<smem>>
    %9 = vector.broadcast %8 : f32 to vector<16x128xf32>
    %10 = arith.mulf %4, %9 : vector<16x128xf32>
    %11 = arith.addf %7, %10 : vector<16x128xf32>
    %c0_4 = arith.constant 0 : index
    %12 = memref.load %arg2[%c0_4] : memref<10xf32, #tpu.memory_space<smem>>
    %13 = vector.broadcast %12 : f32 to vector<16x128xf32>
    %14 = arith.addf %11, %13 : vector<16x128xf32>
    %cst_5 = arith.constant 0.000000e+00 : f32
    %15 = vector.broadcast %cst_5 : f32 to vector<16x128xf32>
    %16 = arith.maximumf %14, %15 : vector<16x128xf32>
    %c0_6 = arith.constant 0 : index
    %17 = memref.load %arg3[%c0_6] : memref<10xf32, #tpu.memory_space<smem>>
    %18 = vector.broadcast %17 : f32 to vector<16x128xf32>
    %19 = arith.mulf %16, %18 : vector<16x128xf32>
    %c1 = arith.constant 1 : index
    %20 = memref.load %arg1[%c1] : memref<20xf32, #tpu.memory_space<smem>>
    %21 = vector.broadcast %20 : f32 to vector<16x128xf32>
    %22 = arith.mulf %3, %21 : vector<16x128xf32>
    %c11 = arith.constant 11 : index
    %23 = memref.load %arg1[%c11] : memref<20xf32, #tpu.memory_space<smem>>
    %24 = vector.broadcast %23 : f32 to vector<16x128xf32>
    %25 = arith.mulf %4, %24 : vector<16x128xf32>
    %26 = arith.addf %22, %25 : vector<16x128xf32>
    %c1_7 = arith.constant 1 : index
    %27 = memref.load %arg2[%c1_7] : memref<10xf32, #tpu.memory_space<smem>>
    %28 = vector.broadcast %27 : f32 to vector<16x128xf32>
    %29 = arith.addf %26, %28 : vector<16x128xf32>
    %cst_8 = arith.constant 0.000000e+00 : f32
    %30 = vector.broadcast %cst_8 : f32 to vector<16x128xf32>
    %31 = arith.maximumf %29, %30 : vector<16x128xf32>
    %c1_9 = arith.constant 1 : index
    %32 = memref.load %arg3[%c1_9] : memref<10xf32, #tpu.memory_space<smem>>
    %33 = vector.broadcast %32 : f32 to vector<16x128xf32>
    %34 = arith.mulf %31, %33 : vector<16x128xf32>
    %35 = arith.addf %19, %34 : vector<16x128xf32>
    %c2 = arith.constant 2 : index
    %36 = memref.load %arg1[%c2] : memref<20xf32, #tpu.memory_space<smem>>
    %37 = vector.broadcast %36 : f32 to vector<16x128xf32>
    %38 = arith.mulf %3, %37 : vector<16x128xf32>
    %c12 = arith.constant 12 : index
    %39 = memref.load %arg1[%c12] : memref<20xf32, #tpu.memory_space<smem>>
    %40 = vector.broadcast %39 : f32 to vector<16x128xf32>
    %41 = arith.mulf %4, %40 : vector<16x128xf32>
    %42 = arith.addf %38, %41 : vector<16x128xf32>
    %c2_10 = arith.constant 2 : index
    %43 = memref.load %arg2[%c2_10] : memref<10xf32, #tpu.memory_space<smem>>
    %44 = vector.broadcast %43 : f32 to vector<16x128xf32>
    %45 = arith.addf %42, %44 : vector<16x128xf32>
    %cst_11 = arith.constant 0.000000e+00 : f32
    %46 = vector.broadcast %cst_11 : f32 to vector<16x128xf32>
    %47 = arith.maximumf %45, %46 : vector<16x128xf32>
    %c2_12 = arith.constant 2 : index
    %48 = memref.load %arg3[%c2_12] : memref<10xf32, #tpu.memory_space<smem>>
    %49 = vector.broadcast %48 : f32 to vector<16x128xf32>
    %50 = arith.mulf %47, %49 : vector<16x128xf32>
    %51 = arith.addf %35, %50 : vector<16x128xf32>
    %c3 = arith.constant 3 : index
    %52 = memref.load %arg1[%c3] : memref<20xf32, #tpu.memory_space<smem>>
    %53 = vector.broadcast %52 : f32 to vector<16x128xf32>
    %54 = arith.mulf %3, %53 : vector<16x128xf32>
    %c13 = arith.constant 13 : index
    %55 = memref.load %arg1[%c13] : memref<20xf32, #tpu.memory_space<smem>>
    %56 = vector.broadcast %55 : f32 to vector<16x128xf32>
    %57 = arith.mulf %4, %56 : vector<16x128xf32>
    %58 = arith.addf %54, %57 : vector<16x128xf32>
    %c3_13 = arith.constant 3 : index
    %59 = memref.load %arg2[%c3_13] : memref<10xf32, #tpu.memory_space<smem>>
    %60 = vector.broadcast %59 : f32 to vector<16x128xf32>
    %61 = arith.addf %58, %60 : vector<16x128xf32>
    %cst_14 = arith.constant 0.000000e+00 : f32
    %62 = vector.broadcast %cst_14 : f32 to vector<16x128xf32>
    %63 = arith.maximumf %61, %62 : vector<16x128xf32>
    %c3_15 = arith.constant 3 : index
    %64 = memref.load %arg3[%c3_15] : memref<10xf32, #tpu.memory_space<smem>>
    %65 = vector.broadcast %64 : f32 to vector<16x128xf32>
    %66 = arith.mulf %63, %65 : vector<16x128xf32>
    %67 = arith.addf %51, %66 : vector<16x128xf32>
    %c4 = arith.constant 4 : index
    %68 = memref.load %arg1[%c4] : memref<20xf32, #tpu.memory_space<smem>>
    %69 = vector.broadcast %68 : f32 to vector<16x128xf32>
    %70 = arith.mulf %3, %69 : vector<16x128xf32>
    %c14 = arith.constant 14 : index
    %71 = memref.load %arg1[%c14] : memref<20xf32, #tpu.memory_space<smem>>
    %72 = vector.broadcast %71 : f32 to vector<16x128xf32>
    %73 = arith.mulf %4, %72 : vector<16x128xf32>
    %74 = arith.addf %70, %73 : vector<16x128xf32>
    %c4_16 = arith.constant 4 : index
    %75 = memref.load %arg2[%c4_16] : memref<10xf32, #tpu.memory_space<smem>>
    %76 = vector.broadcast %75 : f32 to vector<16x128xf32>
    %77 = arith.addf %74, %76 : vector<16x128xf32>
    %cst_17 = arith.constant 0.000000e+00 : f32
    %78 = vector.broadcast %cst_17 : f32 to vector<16x128xf32>
    %79 = arith.maximumf %77, %78 : vector<16x128xf32>
    %c4_18 = arith.constant 4 : index
    %80 = memref.load %arg3[%c4_18] : memref<10xf32, #tpu.memory_space<smem>>
    %81 = vector.broadcast %80 : f32 to vector<16x128xf32>
    %82 = arith.mulf %79, %81 : vector<16x128xf32>
    %83 = arith.addf %67, %82 : vector<16x128xf32>
    %c5 = arith.constant 5 : index
    %84 = memref.load %arg1[%c5] : memref<20xf32, #tpu.memory_space<smem>>
    %85 = vector.broadcast %84 : f32 to vector<16x128xf32>
    %86 = arith.mulf %3, %85 : vector<16x128xf32>
    %c15 = arith.constant 15 : index
    %87 = memref.load %arg1[%c15] : memref<20xf32, #tpu.memory_space<smem>>
    %88 = vector.broadcast %87 : f32 to vector<16x128xf32>
    %89 = arith.mulf %4, %88 : vector<16x128xf32>
    %90 = arith.addf %86, %89 : vector<16x128xf32>
    %c5_19 = arith.constant 5 : index
    %91 = memref.load %arg2[%c5_19] : memref<10xf32, #tpu.memory_space<smem>>
    %92 = vector.broadcast %91 : f32 to vector<16x128xf32>
    %93 = arith.addf %90, %92 : vector<16x128xf32>
    %cst_20 = arith.constant 0.000000e+00 : f32
    %94 = vector.broadcast %cst_20 : f32 to vector<16x128xf32>
    %95 = arith.maximumf %93, %94 : vector<16x128xf32>
    %c5_21 = arith.constant 5 : index
    %96 = memref.load %arg3[%c5_21] : memref<10xf32, #tpu.memory_space<smem>>
    %97 = vector.broadcast %96 : f32 to vector<16x128xf32>
    %98 = arith.mulf %95, %97 : vector<16x128xf32>
    %99 = arith.addf %83, %98 : vector<16x128xf32>
    %c6 = arith.constant 6 : index
    %100 = memref.load %arg1[%c6] : memref<20xf32, #tpu.memory_space<smem>>
    %101 = vector.broadcast %100 : f32 to vector<16x128xf32>
    %102 = arith.mulf %3, %101 : vector<16x128xf32>
    %c16 = arith.constant 16 : index
    %103 = memref.load %arg1[%c16] : memref<20xf32, #tpu.memory_space<smem>>
    %104 = vector.broadcast %103 : f32 to vector<16x128xf32>
    %105 = arith.mulf %4, %104 : vector<16x128xf32>
    %106 = arith.addf %102, %105 : vector<16x128xf32>
    %c6_22 = arith.constant 6 : index
    %107 = memref.load %arg2[%c6_22] : memref<10xf32, #tpu.memory_space<smem>>
    %108 = vector.broadcast %107 : f32 to vector<16x128xf32>
    %109 = arith.addf %106, %108 : vector<16x128xf32>
    %cst_23 = arith.constant 0.000000e+00 : f32
    %110 = vector.broadcast %cst_23 : f32 to vector<16x128xf32>
    %111 = arith.maximumf %109, %110 : vector<16x128xf32>
    %c6_24 = arith.constant 6 : index
    %112 = memref.load %arg3[%c6_24] : memref<10xf32, #tpu.memory_space<smem>>
    %113 = vector.broadcast %112 : f32 to vector<16x128xf32>
    %114 = arith.mulf %111, %113 : vector<16x128xf32>
    %115 = arith.addf %99, %114 : vector<16x128xf32>
    %c7 = arith.constant 7 : index
    %116 = memref.load %arg1[%c7] : memref<20xf32, #tpu.memory_space<smem>>
    %117 = vector.broadcast %116 : f32 to vector<16x128xf32>
    %118 = arith.mulf %3, %117 : vector<16x128xf32>
    %c17 = arith.constant 17 : index
    %119 = memref.load %arg1[%c17] : memref<20xf32, #tpu.memory_space<smem>>
    %120 = vector.broadcast %119 : f32 to vector<16x128xf32>
    %121 = arith.mulf %4, %120 : vector<16x128xf32>
    %122 = arith.addf %118, %121 : vector<16x128xf32>
    %c7_25 = arith.constant 7 : index
    %123 = memref.load %arg2[%c7_25] : memref<10xf32, #tpu.memory_space<smem>>
    %124 = vector.broadcast %123 : f32 to vector<16x128xf32>
    %125 = arith.addf %122, %124 : vector<16x128xf32>
    %cst_26 = arith.constant 0.000000e+00 : f32
    %126 = vector.broadcast %cst_26 : f32 to vector<16x128xf32>
    %127 = arith.maximumf %125, %126 : vector<16x128xf32>
    %c7_27 = arith.constant 7 : index
    %128 = memref.load %arg3[%c7_27] : memref<10xf32, #tpu.memory_space<smem>>
    %129 = vector.broadcast %128 : f32 to vector<16x128xf32>
    %130 = arith.mulf %127, %129 : vector<16x128xf32>
    %131 = arith.addf %115, %130 : vector<16x128xf32>
    %c8 = arith.constant 8 : index
    %132 = memref.load %arg1[%c8] : memref<20xf32, #tpu.memory_space<smem>>
    %133 = vector.broadcast %132 : f32 to vector<16x128xf32>
    %134 = arith.mulf %3, %133 : vector<16x128xf32>
    %c18 = arith.constant 18 : index
    %135 = memref.load %arg1[%c18] : memref<20xf32, #tpu.memory_space<smem>>
    %136 = vector.broadcast %135 : f32 to vector<16x128xf32>
    %137 = arith.mulf %4, %136 : vector<16x128xf32>
    %138 = arith.addf %134, %137 : vector<16x128xf32>
    %c8_28 = arith.constant 8 : index
    %139 = memref.load %arg2[%c8_28] : memref<10xf32, #tpu.memory_space<smem>>
    %140 = vector.broadcast %139 : f32 to vector<16x128xf32>
    %141 = arith.addf %138, %140 : vector<16x128xf32>
    %cst_29 = arith.constant 0.000000e+00 : f32
    %142 = vector.broadcast %cst_29 : f32 to vector<16x128xf32>
    %143 = arith.maximumf %141, %142 : vector<16x128xf32>
    %c8_30 = arith.constant 8 : index
    %144 = memref.load %arg3[%c8_30] : memref<10xf32, #tpu.memory_space<smem>>
    %145 = vector.broadcast %144 : f32 to vector<16x128xf32>
    %146 = arith.mulf %143, %145 : vector<16x128xf32>
    %147 = arith.addf %131, %146 : vector<16x128xf32>
    %c9 = arith.constant 9 : index
    %148 = memref.load %arg1[%c9] : memref<20xf32, #tpu.memory_space<smem>>
    %149 = vector.broadcast %148 : f32 to vector<16x128xf32>
    %150 = arith.mulf %3, %149 : vector<16x128xf32>
    %c19 = arith.constant 19 : index
    %151 = memref.load %arg1[%c19] : memref<20xf32, #tpu.memory_space<smem>>
    %152 = vector.broadcast %151 : f32 to vector<16x128xf32>
    %153 = arith.mulf %4, %152 : vector<16x128xf32>
    %154 = arith.addf %150, %153 : vector<16x128xf32>
    %c9_31 = arith.constant 9 : index
    %155 = memref.load %arg2[%c9_31] : memref<10xf32, #tpu.memory_space<smem>>
    %156 = vector.broadcast %155 : f32 to vector<16x128xf32>
    %157 = arith.addf %154, %156 : vector<16x128xf32>
    %cst_32 = arith.constant 0.000000e+00 : f32
    %158 = vector.broadcast %cst_32 : f32 to vector<16x128xf32>
    %159 = arith.maximumf %157, %158 : vector<16x128xf32>
    %c9_33 = arith.constant 9 : index
    %160 = memref.load %arg3[%c9_33] : memref<10xf32, #tpu.memory_space<smem>>
    %161 = vector.broadcast %160 : f32 to vector<16x128xf32>
    %162 = arith.mulf %159, %161 : vector<16x128xf32>
    %163 = arith.addf %147, %162 : vector<16x128xf32>
    %c0_34 = arith.constant 0 : index
    %164 = memref.load %arg4[%c0_34] : memref<1xf32, #tpu.memory_space<smem>>
    %165 = vector.broadcast %164 : f32 to vector<16x128xf32>
    %166 = arith.addf %163, %165 : vector<16x128xf32>
    %c0_35 = arith.constant 0 : index
    %c0_36 = arith.constant 0 : index
    %167 = vector.load %arg7[%c0_35, %c0_36] : memref<16x128xf32, #tpu.memory_space<vmem>>, vector<16x128xf32>
    tpu.vector_store %arg7[%c0_35, %c0_36], %166 {strides = array<i32>} : memref<16x128xf32, #tpu.memory_space<vmem>>, vector<16x128xf32>,
    return
  }
  func.func @transform_0(%arg0: i32) -> i32 {
    %c0_i32 = arith.constant 0 : i32
    %c0_i32_0 = arith.constant 0 : i32
    return %c0_i32 : i32
  }
  func.func @transform_1(%arg0: i32) -> i32 {
    %c0_i32 = arith.constant 0 : i32
    %c0_i32_0 = arith.constant 0 : i32
    return %c0_i32 : i32
  }
  func.func @transform_2(%arg0: i32) -> i32 {
    %c0_i32 = arith.constant 0 : i32
    %c0_i32_0 = arith.constant 0 : i32
    return %c0_i32 : i32
  }
  func.func @transform_3(%arg0: i32) -> i32 {
    %c0_i32 = arith.constant 0 : i32
    %c0_i32_0 = arith.constant 0 : i32
    return %c0_i32 : i32
  }
  func.func @transform_4(%arg0: i32) -> (i32, i32) {
    %c0_i32 = arith.constant 0 : i32
    %c0_i32_0 = arith.constant 0 : i32
    %c0_i32_1 = arith.constant 0 : i32
    return %c0_i32, %c0_i32_0 : i32, i32
  }
  func.func @transform_5(%arg0: i32) -> (i32, i32) {
    %c0_i32 = arith.constant 0 : i32
    %c0_i32_0 = arith.constant 0 : i32
    return %arg0, %c0_i32 : i32, i32
  }
  func.func @transform_6(%arg0: i32) -> (i32, i32) {
    %c0_i32 = arith.constant 0 : i32
    %c0_i32_0 = arith.constant 0 : i32
    return %arg0, %c0_i32 : i32, i32
  }
}

</mosaic_0001>

<bundles_post_ra>
// kernel: sum_predikce_forward.1
= control target key start
LH: loop header
LB: loop body
LE: loop exit
PB: predicated region body
PF: predicated region fallthrough
CT: control target
= control target key end

     0   :  { %s4463_s0 = inlined_call_operand.vmem [shape: f32[20], index: 0, kind: input, shape index: {}]   ;;  %s4464_s1 = inlined_call_operand.vmem [shape: f32[10], index: 1, kind: input, shape index: {}]   ;;  %s4465_s2 = inlined_call_operand.vmem [shape: f32[10], index: 2, kind: input, shape index: {}]   ;;  %s4466_s3 = inlined_call_operand.<no memory space> [shape: f32[1], index: 3, kind: input, shape index: {}]   ;;  %s4467_s4 = inlined_call_operand.vmem [shape: f32[256,256], index: 4, kind: input, shape index: {}]   ;;  %s4468_s5 = inlined_call_operand.vmem [shape: f32[24,256], index: 5, kind: input, shape index: {}]   ;;  %s4469_s6 = inlined_call_operand.vmem [shape: f32[24,128], index: 6, kind: output, shape index: {}]  }
   0x1   :  { %4650 = sst [smem:[#allocation129_spill]] %s4463_s0 }
   0x2   :  { %4651 = sst [smem:[#allocation130_spill]] %s4464_s1 }
   0x3   :  { %4652 = sst [smem:[#allocation131_spill]] %s4465_s2 }
   0x4   :  { %4653 = sst [smem:[#allocation132_spill]] %s4467_s4 }
   0x5   :  { %4654 = sst [smem:[#allocation133_spill]] %s4468_s5 }
   0x6   :  { %4655 = sst [smem:[#allocation134_spill]] %s4469_s6 }
   0x7   :  { %11 = sst [smem:[#allocation2]] %s4466_s3 }
   0x8   :  { %12 = vsyncpa [#allocation4], 0 }
   0x9   :  { %13 = vsyncpa [#allocation6], 0  ;;  %s2986_s23 = smov 0   ;;  %s2988_s24 = smov 0  }
   0xa   :  { %s2990_s25 = smov 0  }
   0xb LB: > { %4656 = sst [smem:[#allocation11_spill]] %s2903_s23  ;;  %s2999_s3 = sadd.s32 4294967295, %s2911_s25   ;;  %s2911_s25 = sphi %s2990_s25, %s4989_s25   ;;  %s2907_s24 = sphi %s2988_s24, %s4991_s24   ;;  %s2903_s23 = sphi %s2986_s23, %s4990_s23  }
   0xc   : > { %4657 = sst [smem:[#allocation12_spill]] %s2907_s24  ;;  %s3001_s26 = sadd.s32 1, %s2911_s25  }
   0xd   : > { %4658 = sst [smem:[#allocation13_spill]] %s2999_s3  ;;  %s154_s27 = ssub.s32 %s2911_s25, %s3001_s26 }
   0xe   : > { %4659 = sst [smem:[#allocation14_spill]] %s3001_s26  ;;  %s157_s28 = sadd.s32 1, %s2907_s24 }
   0xf   : > { %p155_p0 = scmp.eq.s32.totalorder %s154_s27, 0  ;;  %p167_p1 = scmp.ne.s32.totalorder %s2907_s24, %s2903_s23 }
  0x10   : > { %p168_p2 = scmp.eq.s32.totalorder %s2999_s3, 1  ;;  %p2210_p3 = scmp.ge.s32.totalorder %s2911_s25, 1 }
  0x11   : > { %s3009_s29 = scalar_select %p155_p0, %s2907_s24, %s157_s28  }
  0x12   : > { %p3011_p4 = por %p168_p2, %p167_p1  ;;  %p181_p5 = scmp.lt.s32.totalorder %s2911_s25, 3 }
  0x13   : > { %4660 = sst [smem:[#allocation15_spill]] %s3009_s29  ;;  %p4470_p6 = scmp.eq.s32.totalorder %s2999_s3, 0 }
  0x14   : > { %s4661_s30 = scalar_select %p3011_p4, 1, 0 }
  0x15   : > { %p3016_p7 = pnand %p2210_p3, %p181_p5  ;;  %s4664_s1 = sld [smem:[#allocation130_spill]] }
  0x16   : > { %4662 = sst [smem:[#allocation16_spill]] %s4661_s30  ;;  %s4665_s0 = sld [smem:[#allocation129_spill]] }
  0x17   : > { %s4663_s7 = scalar_select %p3016_p7, 1, 0 }
  0x18   : > { %p2697_p8 = pneg %p3016_p7  ;;  %s4667_s2 = sld [smem:[#allocation131_spill]] }
  0x1a   : > { %p3030_p9 = pnand %p4470_p6, %p2697_p8 }
  0x1b   : > { %s205_s10 = sshll.u32 %s4664_s1, 4  ;;  %s206_s10 = int_to_ptr.vmem [resolvable:$true] %s205_s10 }
  0x1c   : > { %s194_s13 = sshll.u32 %s4665_s0, 4  ;;  %s2804_s18 = scalar_lea.vmem %s206_s10, 16  ;;  %s195_s13 = int_to_ptr.vmem [resolvable:$true] %s194_s13 }
  0x1d   : > { %p2805_p10 = scmp.ne.s32.totalorder %s206_s10, %s2804_s18  ;;  %p2806_p11 = pneg %p3030_p9 }
  0x1e   : > { %s216_s17 = sshll.u32 %s4667_s2, 4  ;;  %p2812_p0 = scmp.lt.s32.totalorder %s206_s10, %s206_s10  ;;  %s3037_s17 = int_to_ptr.vmem [resolvable:$true] %s216_s17 }
  0x1f   : > { %p2807_p12 = pnand %p2806_p11, %p2805_p10  ;;  %p2813_p1 = scmp.lt.s32.totalorder %s2804_s18, %s2804_s18 }
  0x21   : > { %p2808_p13 = pneg %p2807_p12  ;;  %p2814_p2 = por %p2813_p1, %p2812_p0 }
  0x23   : > { %p2815_p3 = pnand %p2814_p2, %p2808_p13 }
  0x25   : > { %2818 = shalt.err (!%p2815_p3)
}
  0x26   : > { %s2945_s19 = smov [#allocation5]   ;;  %s2819_s20 = scalar_lea.vmem %s195_s13, 16 }
  0x27   : > { %2703 = dma.vmem_to_smem (!%p3030_p9), %s206_s10, 16, %s2945_s19, [#allocation6]  }
  0x28   : > { %p2820_p5 = scmp.ne.s32.totalorder %s195_s13, %s2819_s20  ;;  %p2827_p4 = scmp.lt.s32.totalorder %s195_s13, %s195_s13 }
  0x29   : > { %p2828_p7 = scmp.lt.s32.totalorder %s2819_s20, %s2819_s20 }
  0x2a   : > { %p2822_p8 = pnand %p2820_p5, %p2806_p11 }
  0x2b   : > { %p2829_p10 = por %p2828_p7, %p2827_p4 }
  0x2c   : > { %p2823_p6 = pneg %p2822_p8 }
  0x2e   : > { %p2830_p12 = pnand %p2829_p10, %p2823_p6 }
  0x30   : > { %2833 = shalt.err (!%p2830_p12)
}
  0x31   : > { %s2946_s21 = smov [#allocation3]   ;;  %s2834_s22 = scalar_lea.vmem %s3037_s17, 16 }
  0x32   : > { %2700 = dma.vmem_to_smem (!%p3030_p9), %s195_s13, 16, %s2946_s21, [#allocation4]  }
  0x33   : > { %p2835_p13 = scmp.ne.s32.totalorder %s3037_s17, %s2834_s22  ;;  %p2842_p2 = scmp.lt.s32.totalorder %s3037_s17, %s3037_s17 }
  0x34   : > { %p2843_p3 = scmp.lt.s32.totalorder %s2834_s22, %s2834_s22 }
  0x35   : > { %p2837_p0 = pnand %p2835_p13, %p2806_p11 }
  0x36   : > { %p2844_p4 = por %p2843_p3, %p2842_p2 }
  0x37   : > { %p2838_p1 = pneg %p2837_p0 }
  0x39   : > { %p2845_p6 = pnand %p2844_p4, %p2838_p1 }
  0x3b   : > { %2848 = shalt.err (!%p2845_p6)
}
  0x3c   : > { %s2947_s25 = smov [#allocation7]   ;;  %p4668_p7 = scmp.ne.s32.totalorder %s4663_s7, 0 }
  0x3d   : > { %2706 = dma.vmem_to_smem (!%p3030_p9), %s3037_s17, 16, %s2947_s25, [#allocation6]  }
  0x3e   : > { %255 = sbr.rel (%p4668_p7) target bundleno = 597 (0x255), region = 44 }
  0x45   : > { %p4669_p5 = scmp.eq.s32.totalorder %s2999_s3, 0 }
  0x47   : > { %2894 = dma.done.wait (%p4669_p5), [#allocation4], 16   ;;  %p4670_p11 = pmov %p4669_p5 }
  0x48   : > { %p4671_p8 = pmov %p4669_p5 }
  0x49   : > { %2896 = vsyncadd (%p4670_p11), [#allocation4], 4294967280 }
  0x4a   : > { %2898 = dma.done.wait (%p4671_p8), [#allocation6], 32   ;;  %p4672_p10 = pmov %p4669_p5 }
  0x4c   : > { %2900 = vsyncadd (%p4672_p10), [#allocation6], 4294967264 }
  0x4d   : > { %269 = sfence }
  0x4e   : > { %s4673_s4 = sld [smem:[#allocation132_spill]]  ;;  %s3274_s20 = sshll.u32 %s2999_s3, 1 }
  0x4f   : > { %4706 = sst [smem:[#allocation49_spill]] %s3274_s20  ;;  %p305_p9 = scmp.lt.s32.totalorder %s3274_s20, 2 }
  0x50   : > { %s4740_s5 = sld [smem:[#allocation133_spill]]  ;;  %s4094_s9 = sld [smem:[#allocation3]] }
  0x51   : > { %s3356_s7 = scalar_select %p305_p9, %s3274_s20, 2 }
  0x52   : > { %s4096_s10 = sld [smem:[#allocation3 + $0x1]]  ;;  %s4098_s11 = sld [smem:[#allocation3 + $0x2]] }
  0x53   : > { %s2277_s22 = sshll.u32 %s3356_s7, 4  ;;  %s4100_s12 = sld [smem:[#allocation3 + $0x3]] }
  0x54   : > { %v326_v0 = vld [vmem:[%s4673_s4 + $0x8] sm:$0xff]  ;;  %v328_v1 = vld [vmem:[%s4673_s4 + $0x18] sm:$0xff]  ;;  %v325_v2 = vld [vmem:[%s4673_s4] sm:$0xff]  ;;  %s4102_s13 = sld [smem:[#allocation3 + $0x4]]  ;;  %s4106_s15 = sld [smem:[#allocation3 + $0x6]] }
  0x55   : > { %v389_v3 = vand.u32 4294901760, %v326_v0  ;;  %v393_v4 = vand.u32 4294901760, %v328_v1  ;;  %v327_v5 = vld [vmem:[%s4673_s4 + $0x10] sm:$0xff]  ;;  %v391_v6 = vand.u32 4294901760, %v325_v2  ;;  %v330_v7 = vld [vmem:[%s4673_s4 + $0x28] sm:$0xff]  ;;  %v332_v8 = vld [vmem:[%s4673_s4 + $0x38] sm:$0xff] }
  0x56   : > { %v395_v9 = vand.u32 4294901760, %v327_v5  ;;  %v397_v10 = vand.u32 4294901760, %v330_v7  ;;  %v401_v11 = vand.u32 4294901760, %v332_v8  ;;  %v329_v12 = vld [vmem:[%s4673_s4 + $0x20] sm:$0xff]  ;;  %v331_v13 = vld [vmem:[%s4673_s4 + $0x30] sm:$0xff]  ;;  %v334_v14 = vld [vmem:[%s4673_s4 + $0x48] sm:$0xff]  ;;  %s3432_s14 = scalar_lea.vmem %s4740_s5, %s2277_s22 }
  0x57   : > { %v3098_v15 = vpack.c.bf16 %v393_v4, %v389_v3  ;;  %v336_v16 = vld [vmem:[%s4673_s4 + $0x58] sm:$0xff]  ;;  %v333_v17 = vld [vmem:[%s4673_s4 + $0x40] sm:$0xff]  ;;  %v335_v18 = vld [vmem:[%s4673_s4 + $0x50] sm:$0xff]  ;;  %v399_v23 = vand.u32 4294901760, %v329_v12  ;;  %v403_v24 = vand.u32 4294901760, %v331_v13  ;;  %v405_v25 = vand.u32 4294901760, %v334_v14 }
  0x58   : > { %v3109_v19 = vpack.c.bf16 %v395_v9, %v391_v6  ;;  %v3111_v20 = vpack.c.bf16 %v401_v11, %v397_v10  ;;  %v338_v21 = vld [vmem:[%s4673_s4 + $0x68] sm:$0xff]  ;;  %v340_v22 = vld [vmem:[%s4673_s4 + $0x78] sm:$0xff]  ;;  %v3121_v26 = vsub.f32 %v326_v0, %v389_v3  ;;  %v409_v27 = vand.u32 4294901760, %v336_v16  ;;  %v337_v34 = vld [vmem:[%s4673_s4 + $0x60] sm:$0xff]  ;;  %4933 = sst [smem:[#allocation107_spill]] %s4094_s9  ;;  %s4110_s17 = sld [smem:[#allocation3 + $0x8]] }
  0x59   : > { %4674 = vst [vmem:[#allocation17_spill] sm:$0xff] %v3098_v15  ;;  %2282 = vmatprep.subr.bf16.mxu1 %v3098_v15  ;;  %2474 = vmatprep.subr.bf16.mxu0 %v3098_v15  ;;  %v407_v28 = vand.u32 4294901760, %v333_v17  ;;  %v411_v29 = vand.u32 4294901760, %v335_v18  ;;  %v3125_v30 = vsub.f32 %v328_v1, %v393_v4  ;;  %v3129_v31 = vpack.c.bf16 %v403_v24, %v399_v23  ;;  %v339_v35 = vld [vmem:[%s4673_s4 + $0x70] sm:$0xff]  ;;  %v342_v36 = vld [vmem:[%s4673_s4 + $0x88] sm:$0xff]  ;;  %v344_v41 = vld [vmem:[%s4673_s4 + $0x98] sm:$0xff] }
  0x5a   : > { %4675 = vst [vmem:[#allocation18_spill] sm:$0xff] %v3109_v19  ;;  %4676 = vst [vmem:[#allocation19_spill] sm:$0xff] %v3111_v20  ;;  %2284 = vmatpush1.bf16.msra.mxu1 %v3109_v19  ;;  %2476 = vmatpush1.bf16.msra.mxu0 %v3109_v19  ;;  %v413_v32 = vand.u32 4294901760, %v338_v21  ;;  %v417_v33 = vand.u32 4294901760, %v340_v22  ;;  %v3140_v37 = vsub.f32 %v325_v2, %v391_v6  ;;  %v341_v42 = vld [vmem:[%s4673_s4 + $0x80] sm:$0xff]  ;;  %v343_v43 = vld [vmem:[%s4673_s4 + $0x90] sm:$0xff] }
  0x5b   : > { %4677 = vst [vmem:[#allocation20_spill] sm:$0xff] %v3121_v26  ;;  %4678 = vst [vmem:[#allocation21_spill] sm:$0xff] %v3125_v30  ;;  %2286 = vmatprep.subr.bf16.mxu1 %v3111_v20  ;;  %2478 = vmatprep.subr.bf16.mxu0 %v3111_v20  ;;  %v3142_v38 = vsub.f32 %v327_v5, %v395_v9  ;;  %v3144_v39 = vsub.f32 %v330_v7, %v397_v10  ;;  %v415_v49 = vand.u32 4294901760, %v337_v34  ;;  %v346_v52 = vld [vmem:[%s4673_s4 + $0xa8] sm:$0xff]  ;;  %v348_v57 = vld [vmem:[%s4673_s4 + $0xb8] sm:$0xff]  ;;  %4934 = sst [smem:[#allocation108_spill]] %s4096_s10 }
  0x5c   : > { %4679 = vst [vmem:[#allocation22_spill] sm:$0xff] %v3129_v31  ;;  %4680 = vst [vmem:[#allocation23_spill] sm:$0xff] %v3140_v37  ;;  %v3146_v40 = vpack.c.bf16 %v409_v27, %v405_v25  ;;  %v3157_v44 = vsub.f32 %v332_v8, %v401_v11  ;;  %v3159_v45 = vsub.f32 %v329_v12, %v399_v23  ;;  %v419_v50 = vand.u32 4294901760, %v339_v35  ;;  %v345_v62 = vld [vmem:[%s4673_s4 + $0xa0] sm:$0xff]  ;;  %v347_v3 = vld [vmem:[%s4673_s4 + $0xb0] sm:$0xff]  ;;  %4935 = sst [smem:[#allocation109_spill]] %s4098_s11 }
  0x5d   : > { %4681 = vst [vmem:[#allocation24_spill] sm:$0xff] %v3142_v38  ;;  %4682 = vst [vmem:[#allocation25_spill] sm:$0xff] %v3144_v39  ;;  %v3161_v46 = vsub.f32 %v331_v13, %v403_v24  ;;  %v3163_v47 = vsub.f32 %v334_v14, %v405_v25  ;;  %v3167_v48 = vpack.c.bf16 %v411_v29, %v407_v28  ;;  %v421_v51 = vand.u32 4294901760, %v342_v36  ;;  %v350_v4 = vld [vmem:[%s4673_s4 + $0xc8] sm:$0xff]  ;;  %v352_v5 = vld [vmem:[%s4673_s4 + $0xd8] sm:$0xff]  ;;  %4936 = sst [smem:[#allocation110_spill]] %s4100_s12 }
  0x5e   : > { %4683 = vst [vmem:[#allocation26_spill] sm:$0xff] %v3146_v40  ;;  %4684 = vst [vmem:[#allocation27_spill] sm:$0xff] %v3157_v44  ;;  %2288 = vmatpush1.bf16.msra.mxu1 %v3129_v31  ;;  %2480 = vmatpush1.bf16.msra.mxu0 %v3129_v31  ;;  %v3174_v53 = vpack.c.bf16 %v417_v33, %v413_v32  ;;  %v425_v54 = vand.u32 4294901760, %v344_v41  ;;  %v423_v55 = vand.u32 4294901760, %v341_v42  ;;  %v427_v56 = vand.u32 4294901760, %v343_v43  ;;  %v349_v10 = vld [vmem:[%s4673_s4 + $0xc0] sm:$0xff] }
  0x5f   : > { %4685 = vst [vmem:[#allocation28_spill] sm:$0xff] %v3167_v48  ;;  %2290 = vmatprep.subr.bf16.mxu1 %v3146_v40  ;;  %2482 = vmatprep.subr.bf16.mxu0 %v3146_v40  ;;  %v3179_v58 = vsub.f32 %v336_v16, %v409_v27  ;;  %v3181_v59 = vsub.f32 %v333_v17, %v407_v28  ;;  %v429_v2 = vand.u32 4294901760, %v346_v52  ;;  %v433_v9 = vand.u32 4294901760, %v348_v57  ;;  %v351_v11 = vld [vmem:[%s4673_s4 + $0xd0] sm:$0xff]  ;;  %v354_v16 = vld [vmem:[%s4673_s4 + $0xe8] sm:$0xff]  ;;  %v356_v17 = vld [vmem:[%s4673_s4 + $0xf8] sm:$0xff] }
  0x60   : > { %4686 = vst [vmem:[#allocation29_spill] sm:$0xff] %v3174_v53  ;;  %v3183_v60 = vsub.f32 %v335_v18, %v411_v29  ;;  %v3185_v61 = vsub.f32 %v338_v21, %v413_v32  ;;  %v3190_v63 = vsub.f32 %v340_v22, %v417_v33  ;;  %v3192_v0 = vpack.c.bf16 %v419_v50, %v415_v49  ;;  %v353_v24 = vld [vmem:[%s4673_s4 + $0xe0] sm:$0xff]  ;;  %v355_v25 = vld [vmem:[%s4673_s4 + $0xf0] sm:$0xff]  ;;  %s4108_s16 = sld [smem:[#allocation3 + $0x7]]  ;;  %4939 = sst [smem:[#allocation113_spill]] %s4110_s17 }
  0x61   : > { %4687 = vst [vmem:[#allocation30_spill] sm:$0xff] %v3179_v58  ;;  %v3194_v1 = vsub.f32 %v337_v34, %v415_v49  ;;  %v3207_v6 = vsub.f32 %v339_v35, %v419_v50  ;;  %v3209_v7 = vpack.c.bf16 %v425_v54, %v421_v51  ;;  %v3211_v8 = vsub.f32 %v342_v36, %v421_v51  ;;  %v358_v36 = vld [vmem:[%s4673_s4 + $0x108] sm:$0xff]  ;;  %v357_v51 = vld [vmem:[%s4673_s4 + $0x100] sm:$0xff]  ;;  %s4112_s18 = sld [smem:[#allocation3 + $0x9]]  ;;  %s4114_s19 = sld [smem:[#allocation3 + $0xa]] }
  0x62   : > { %4688 = vst [vmem:[#allocation31_spill] sm:$0xff] %v3183_v60  ;;  %4689 = vst [vmem:[#allocation32_spill] sm:$0xff] %v3185_v61  ;;  %2292 = vmatpush1.bf16.msra.mxu1 %v3167_v48  ;;  %2484 = vmatpush1.bf16.msra.mxu0 %v3167_v48  ;;  %v3221_v12 = vsub.f32 %v344_v41, %v425_v54  ;;  %v3223_v13 = vpack.c.bf16 %v427_v56, %v423_v55  ;;  %v431_v18 = vand.u32 4294901760, %v345_v62  ;;  %v360_v41 = vld [vmem:[%s4673_s4 + $0x118] sm:$0xff]  ;;  %s4116_s21 = sld [smem:[#allocation3 + $0xb]]  ;;  %s4118_s22 = sld [smem:[#allocation3 + $0xc]] }
  0x63   : > { %4690 = vst [vmem:[#allocation33_spill] sm:$0xff] %v3190_v63  ;;  %4691 = vst [vmem:[#allocation34_spill] sm:$0xff] %v3192_v0  ;;  %2294 = vmatprep.subr.bf16.mxu1 %v3174_v53  ;;  %2486 = vmatprep.subr.bf16.mxu0 %v3174_v53  ;;  %v3225_v14 = vsub.f32 %v341_v42, %v423_v55  ;;  %v435_v21 = vand.u32 4294901760, %v347_v3  ;;  %v437_v22 = vand.u32 4294901760, %v350_v4  ;;  %v441_v23 = vand.u32 4294901760, %v352_v5  ;;  %s4120_s25 = sld [smem:[#allocation3 + $0xd]] }
  0x64   : > { %4692 = vst [vmem:[#allocation35_spill] sm:$0xff] %v3209_v7  ;;  %4693 = vst [vmem:[#allocation36_spill] sm:$0xff] %v3211_v8  ;;  %v3239_v27 = vsub.f32 %v343_v43, %v427_v56  ;;  %v3241_v28 = vsub.f32 %v346_v52, %v429_v2  ;;  %v439_v29 = vand.u32 4294901760, %v349_v10  ;;  %v443_v32 = vand.u32 4294901760, %v351_v11  ;;  %s4122_s27 = sld [smem:[#allocation5]]  ;;  %s4124_s28 = sld [smem:[#allocation5 + $0x1]] }
  0x65   : > { %4694 = vst [vmem:[#allocation37_spill] sm:$0xff] %v3221_v12  ;;  %4695 = vst [vmem:[#allocation38_spill] sm:$0xff] %v3223_v13  ;;  %v3245_v33 = vpack.c.bf16 %v433_v9, %v429_v2  ;;  %v3247_v34 = vsub.f32 %v348_v57, %v433_v9  ;;  %v3249_v35 = vsub.f32 %v345_v62, %v431_v18  ;;  %v445_v42 = vand.u32 4294901760, %v354_v16  ;;  %v359_v57 = vld [vmem:[%s4673_s4 + $0x110] sm:$0xff]  ;;  %s4126_s8 = sld [smem:[#allocation5 + $0x2]]  ;;  %s4128_s7 = sld [smem:[#allocation5 + $0x3]] }
  0x66   : > { %4696 = vst [vmem:[#allocation39_spill] sm:$0xff] %v3225_v14  ;;  %4697 = vst [vmem:[#allocation40_spill] sm:$0xff] %v3239_v27  ;;  %2296 = vmatpush1.bf16.msra.mxu1 %v3192_v0  ;;  %2488 = vmatpush1.bf16.msra.mxu0 %v3192_v0  ;;  %v449_v43 = vand.u32 4294901760, %v356_v17  ;;  %v447_v49 = vand.u32 4294901760, %v353_v24  ;;  %v451_v50 = vand.u32 4294901760, %v355_v25  ;;  %v3262_v52 = vpack.c.bf16 %v435_v21, %v431_v18  ;;  %v363_v0 = vld [vmem:[%s4673_s4 + $0x130] sm:$0xff] }
  0x67   : > { %4698 = vst [vmem:[#allocation41_spill] sm:$0xff] %v3241_v28  ;;  %4699 = vst [vmem:[#allocation42_spill] sm:$0xff] %v3245_v33  ;;  %2298 = vmatprep.subr.bf16.mxu1 %v3209_v7  ;;  %2490 = vmatprep.subr.bf16.mxu0 %v3209_v7  ;;  %v3264_v54 = vsub.f32 %v347_v3, %v435_v21  ;;  %v3266_v55 = vpack.c.bf16 %v441_v23, %v437_v22  ;;  %v453_v9 = vand.u32 4294901760, %v358_v36  ;;  %v362_v3 = vld [vmem:[%s4673_s4 + $0x128] sm:$0xff]  ;;  %4938 = sst [smem:[#allocation112_spill]] %s4108_s16  ;;  %s4130_s0 = sld [smem:[#allocation3 + $0xe]] }
  0x68   : > { %4700 = vst [vmem:[#allocation43_spill] sm:$0xff] %v3247_v34  ;;  %4701 = vst [vmem:[#allocation44_spill] sm:$0xff] %v3249_v35  ;;  %v3268_v56 = vsub.f32 %v350_v4, %v437_v22  ;;  %v3276_v62 = vsub.f32 %v352_v5, %v441_v23  ;;  %v3278_v2 = vpack.c.bf16 %v443_v32, %v439_v29  ;;  %v457_v7 = vand.u32 4294901760, %v360_v41  ;;  %v364_v4 = vld [vmem:[%s4673_s4 + $0x138] sm:$0xff]  ;;  %v361_v23 = vld [vmem:[%s4673_s4 + $0x120] sm:$0xff]  ;;  %4940 = sst [smem:[#allocation114_spill]] %s4112_s18 }
  0x69   : > { %4702 = vst [vmem:[#allocation45_spill] sm:$0xff] %v3262_v52  ;;  %4703 = vst [vmem:[#allocation46_spill] sm:$0xff] %v3264_v54  ;;  %v3288_v18 = vsub.f32 %v349_v10, %v439_v29  ;;  %v3290_v5 = vsub.f32 %v351_v11, %v443_v32  ;;  %v3292_v21 = vsub.f32 %v354_v16, %v445_v42  ;;  %v455_v22 = vand.u32 4294901760, %v357_v51  ;;  %v366_v29 = vld [vmem:[%s4673_s4 + $0x148] sm:$0xff]  ;;  %v368_v32 = vld [vmem:[%s4673_s4 + $0x158] sm:$0xff]  ;;  %s4132_s1 = sld [smem:[#allocation5 + $0x4]] }
  0x6a   : > { %4704 = vst [vmem:[#allocation47_spill] sm:$0xff] %v3266_v55  ;;  %4705 = vst [vmem:[#allocation48_spill] sm:$0xff] %v3268_v56  ;;  %2300 = vmatpush1.bf16.msra.mxu1 %v3223_v13  ;;  %2492 = vmatpush1.bf16.msra.mxu0 %v3223_v13  ;;  %v3302_v13 = vpack.c.bf16 %v449_v43, %v445_v42  ;;  %v3304_v10 = vsub.f32 %v356_v17, %v449_v43  ;;  %v459_v16 = vand.u32 4294901760, %v359_v57  ;;  %v365_v17 = vld [vmem:[%s4673_s4 + $0x140] sm:$0xff]  ;;  %v367_v43 = vld [vmem:[%s4673_s4 + $0x150] sm:$0xff]  ;;  %4941 = sst [smem:[#allocation115_spill]] %s4124_s28 }
  0x6b   : > { %4707 = vst [vmem:[#allocation50_spill] sm:$0xff] %v3276_v62  ;;  %4708 = vst [vmem:[#allocation51_spill] sm:$0xff] %v3278_v2  ;;  %2302 = vmatprep.subr.bf16.mxu1 %v3245_v33  ;;  %2494 = vmatprep.subr.bf16.mxu0 %v3245_v33  ;;  %v3306_v11 = vpack.c.bf16 %v451_v50, %v447_v49  ;;  %v3315_v53 = vsub.f32 %v353_v24, %v447_v49  ;;  %v461_v42 = vand.u32 4294901760, %v362_v3  ;;  %v370_v24 = vld [vmem:[%s4673_s4 + $0x168] sm:$0xff]  ;;  %s4134_s2 = sld [smem:[#allocation7]]  ;;  %s4138_s5 = sld [smem:[#allocation7 + $0x2]] }
  0x6c   : > { %4709 = vst [vmem:[#allocation52_spill] sm:$0xff] %v3288_v18  ;;  %4710 = vst [vmem:[#allocation53_spill] sm:$0xff] %v3290_v5  ;;  %v3317_v48 = vsub.f32 %v355_v25, %v451_v50  ;;  %v465_v33 = vand.u32 4294901760, %v364_v4  ;;  %v3325_v40 = vpack.c.bf16 %v457_v7, %v453_v9  ;;  %v3327_v31 = vsub.f32 %v358_v36, %v453_v9  ;;  %v372_v25 = vld [vmem:[%s4673_s4 + $0x178] sm:$0xff]  ;;  %v322_v18 = vld [vmem:[%s3432_s14 + $0x8] sm:$0xff]  ;;  %s4140_s29 = sld [smem:[#allocation7 + $0x3]] }
  0x6d   : > { %4711 = vst [vmem:[#allocation54_spill] sm:$0xff] %v3292_v21  ;;  %4712 = vst [vmem:[#allocation55_spill] sm:$0xff] %v3302_v13  ;;  %v463_v20 = vand.u32 4294901760, %v361_v23  ;;  %v467_v19 = vand.u32 4294901760, %v363_v0  ;;  %v3337_v49 = vsub.f32 %v360_v41, %v457_v7  ;;  %v3339_v36 = vsub.f32 %v357_v51, %v455_v22  ;;  %v371_v7 = vld [vmem:[%s4673_s4 + $0x170] sm:$0xff]  ;;  %v377_v21 = vld [vmem:[%s4673_s4 + $0x1a0] sm:$0xff] }
  0x6e   : > { %4713 = vst [vmem:[#allocation56_spill] sm:$0xff] %v3304_v10  ;;  %4714 = vst [vmem:[#allocation57_spill] sm:$0xff] %v3306_v11  ;;  %2304 = vmatpush1.bf16.msra.mxu1 %v3262_v52  ;;  %2496 = vmatpush1.bf16.msra.mxu0 %v3262_v52  ;;  %v469_v50 = vand.u32 4294901760, %v366_v29  ;;  %v473_v9 = vand.u32 4294901760, %v368_v32  ;;  %v3343_v15 = vpack.c.bf16 %v459_v16, %v455_v22  ;;  %v369_v52 = vld [vmem:[%s4673_s4 + $0x160] sm:$0xff]  ;;  %v477_v22 = vand.u32 4294901760, %v370_v24 }
  0x6f   : > { %4715 = vst [vmem:[#allocation58_spill] sm:$0xff] %v3315_v53  ;;  %4716 = vst [vmem:[#allocation59_spill] sm:$0xff] %v3317_v48  ;;  %2306 = vmatprep.subr.bf16.mxu1 %v3266_v55  ;;  %2498 = vmatprep.subr.bf16.mxu0 %v3266_v55  ;;  %v471_v48 = vand.u32 4294901760, %v365_v17  ;;  %v475_v53 = vand.u32 4294901760, %v367_v43  ;;  %v3358_v41 = vpack.c.bf16 %v465_v33, %v461_v42  ;;  %v376_v55 = vld [vmem:[%s4673_s4 + $0x198] sm:$0xff]  ;;  %4942 = sst [smem:[#allocation116_spill]] %s4130_s0 }
  0x70   : > { %4717 = vst [vmem:[#allocation60_spill] sm:$0xff] %v3325_v40  ;;  %4718 = vst [vmem:[#allocation61_spill] sm:$0xff] %v3327_v31  ;;  %v3345_v31 = vsub.f32 %v359_v57, %v459_v16  ;;  %v3360_v51 = vsub.f32 %v362_v3, %v461_v42  ;;  %v481_v57 = vand.u32 4294901760, %v372_v25  ;;  %v374_v16 = vld [vmem:[%s4673_s4 + $0x188] sm:$0xff]  ;;  %v3374_v10 = vsub.f32 %v363_v0, %v467_v19  ;;  %v373_v3 = vld [vmem:[%s4673_s4 + $0x180] sm:$0xff]  ;;  %s4142_s24 = sld [smem:[#allocation7 + $0x4]] }
  0x71   : > { %4719 = vst [vmem:[#allocation62_spill] sm:$0xff] %v3337_v49  ;;  %4720 = vst [vmem:[#allocation63_spill] sm:$0xff] %v3339_v36  ;;  %v3370_v36 = vpack.c.bf16 %v467_v19, %v463_v20  ;;  %v3372_v49 = vsub.f32 %v361_v23, %v463_v20  ;;  %v3381_v42 = vpack.c.bf16 %v473_v9, %v469_v50  ;;  %v375_v19 = vld [vmem:[%s4673_s4 + $0x190] sm:$0xff]  ;;  %v378_v20 = vld [vmem:[%s4673_s4 + $0x1a8] sm:$0xff]  ;;  %4943 = sst [smem:[#allocation117_spill]] %s4134_s2  ;;  %s4144_s26 = sld [smem:[#allocation3 + $0xf]] }
  0x72   : > { %4721 = vst [vmem:[#allocation64_spill] sm:$0xff] %v3343_v15  ;;  %4722 = vst [vmem:[#allocation65_spill] sm:$0xff] %v3345_v31  ;;  %v3368_v31 = vsub.f32 %v364_v4, %v465_v33  ;;  %2308 = vmatpush1.bf16.msra.mxu1 %v3278_v2  ;;  %2500 = vmatpush1.bf16.msra.mxu0 %v3278_v2  ;;  %v479_v33 = vand.u32 4294901760, %v369_v52  ;;  %v483_v4 = vand.u32 4294901760, %v371_v7  ;;  %v380_v0 = vld [vmem:[%s4673_s4 + $0x1b8] sm:$0xff]  ;;  %v489_v2 = vand.u32 4294901760, %v376_v55 }
  0x73   : > { %4723 = vst [vmem:[#allocation66_spill] sm:$0xff] %v3358_v41  ;;  %4724 = vst [vmem:[#allocation67_spill] sm:$0xff] %v3360_v51  ;;  %v3383_v51 = vsub.f32 %v366_v29, %v469_v50  ;;  %2310 = vmatprep.subr.bf16.mxu1 %v3302_v13  ;;  %2502 = vmatprep.subr.bf16.mxu0 %v3302_v13  ;;  %v3396_v23 = vsub.f32 %v368_v32, %v473_v9  ;;  %v485_v50 = vand.u32 4294901760, %v374_v16  ;;  %v379_v32 = vld [vmem:[%s4673_s4 + $0x1b0] sm:$0xff]  ;;  %4944 = sst [smem:[#allocation118_spill]] %s4138_s5  ;;  %s4146_s6 = sld [smem:[#allocation5 + $0x5]] }
  0x74   : > { %4725 = vst [vmem:[#allocation68_spill] sm:$0xff] %v3368_v31  ;;  %4726 = vst [vmem:[#allocation69_spill] sm:$0xff] %v3370_v36  ;;  %v3398_v29 = vpack.c.bf16 %v475_v53, %v471_v48  ;;  %v3407_v31 = vsub.f32 %v370_v24, %v477_v22  ;;  %v487_v9 = vand.u32 4294901760, %v373_v3  ;;  %v491_v13 = vand.u32 4294901760, %v375_v19  ;;  %4945 = sst [smem:[#allocation119_spill]] %s4140_s29  ;;  %s4148_s3 = sld [smem:[#allocation7 + $0x5]] }
  0x75   : > { %4727 = vst [vmem:[#allocation70_spill] sm:$0xff] %v3372_v49  ;;  %4728 = vst [vmem:[#allocation71_spill] sm:$0xff] %v3374_v10  ;;  %v3403_v10 = vsub.f32 %v367_v43, %v475_v53  ;;  %v3405_v49 = vpack.c.bf16 %v481_v57, %v477_v22  ;;  %v497_v5 = vand.u32 4294901760, %v380_v0  ;;  %v384_v53 = vld [vmem:[%s4673_s4 + $0x1d8] sm:$0xff]  ;;  %v3425_v43 = vpack.c.bf16 %v483_v4, %v479_v33  ;;  %s4150_s20 = sld [smem:[#allocation3 + $0x10]]  ;;  %s4152_s30 = sld [smem:[#allocation5 + $0x6]] }
  0x76   : > { %4729 = vst [vmem:[#allocation72_spill] sm:$0xff] %v3381_v42  ;;  %4730 = vst [vmem:[#allocation73_spill] sm:$0xff] %v3383_v51  ;;  %v3401_v51 = vsub.f32 %v365_v17, %v471_v48  ;;  %v382_v48 = vld [vmem:[%s4673_s4 + $0x1c8] sm:$0xff]  ;;  %2312 = vmatpush1.bf16.msra.mxu1 %v3306_v11  ;;  %2504 = vmatpush1.bf16.msra.mxu0 %v3306_v11  ;;  %v3423_v17 = vsub.f32 %v372_v25, %v481_v57  ;;  %v495_v25 = vand.u32 4294901760, %v377_v21  ;;  %4946 = sst [smem:[#allocation120_spill]] %s4142_s24  ;;  %s4154_s23 = sld [smem:[#allocation7 + $0x6]] }
  0x77   : > { %4731 = vst [vmem:[#allocation74_spill] sm:$0xff] %v3396_v23  ;;  %4732 = vst [vmem:[#allocation75_spill] sm:$0xff] %v3398_v29  ;;  %v493_v23 = vand.u32 4294901760, %v378_v20  ;;  %v3427_v24 = vsub.f32 %v369_v52, %v479_v33  ;;  %2314 = vmatprep.subr.bf16.mxu1 %v3325_v40  ;;  %2506 = vmatprep.subr.bf16.mxu0 %v3325_v40  ;;  %v3436_v22 = vsub.f32 %v371_v7, %v483_v4  ;;  %v381_v52 = vld [vmem:[%s4673_s4 + $0x1c0] sm:$0xff]  ;;  %v383_v33 = vld [vmem:[%s4673_s4 + $0x1d0] sm:$0xff]  ;;  %4947 = sst [smem:[#allocation121_spill]] %s4144_s26 }
  0x78   : > { %4733 = vst [vmem:[#allocation76_spill] sm:$0xff] %v3401_v51  ;;  %4734 = vst [vmem:[#allocation77_spill] sm:$0xff] %v3403_v10  ;;  %v499_v57 = vand.u32 4294901760, %v379_v32  ;;  %v3446_v11 = vsub.f32 %v374_v16, %v485_v50  ;;  %v501_v40 = vand.u32 4294901760, %v382_v48  ;;  %v505_v7 = vand.u32 4294901760, %v384_v53  ;;  %v386_v51 = vld [vmem:[%s4673_s4 + $0x1e8] sm:$0xff] }
  0x79   : > { %4735 = vst [vmem:[#allocation78_spill] sm:$0xff] %v3405_v49  ;;  %4736 = vst [vmem:[#allocation79_spill] sm:$0xff] %v3407_v31  ;;  %v3438_v31 = vpack.c.bf16 %v489_v2, %v485_v50  ;;  %v3450_v4 = vpack.c.bf16 %v491_v13, %v487_v9  ;;  %v3456_v10 = vpack.c.bf16 %v497_v5, %v493_v23  ;;  %v503_v16 = vand.u32 4294901760, %v381_v52  ;;  %v321_v50 = vld [vmem:[%s3432_s14] sm:$0xff]  ;;  %4948 = sst [smem:[#allocation122_spill]] %s4146_s6  ;;  %s4156_s29 = sld [smem:[#allocation3 + $0x11]] }
  0x7a   : > { %4737 = vst [vmem:[#allocation80_spill] sm:$0xff] %v3423_v17  ;;  %4738 = vst [vmem:[#allocation81_spill] sm:$0xff] %v3425_v43  ;;  %v3454_v17 = vsub.f32 %v375_v19, %v491_v13  ;;  %2316 = vmatpush1.bf16.msra.mxu1 %v3343_v15  ;;  %2508 = vmatpush1.bf16.msra.mxu0 %v3343_v15  ;;  %v3471_v13 = vpack.c.bf16 %v499_v57, %v495_v25  ;;  %v3484_v15 = vand.u32 4294901760, %v322_v18  ;;  %4949 = sst [smem:[#allocation123_spill]] %s4148_s3 }
  0x7b   : > { %4739 = vst [vmem:[#allocation82_spill] sm:$0xff] %v3427_v24  ;;  %4741 = vst [vmem:[#allocation83_spill] sm:$0xff] %v3436_v22  ;;  %v3448_v24 = vsub.f32 %v376_v55, %v489_v2  ;;  %v3452_v22 = vsub.f32 %v373_v3, %v487_v9  ;;  %v3464_v55 = vsub.f32 %v378_v20, %v493_v23  ;;  %v507_v3 = vand.u32 4294901760, %v383_v33  ;;  %v388_v20 = vld [vmem:[%s4673_s4 + $0x1f8] sm:$0xff]  ;;  %4950 = sst [smem:[#allocation124_spill]] %s4150_s20  ;;  %s4162_s3 = sld [smem:[#allocation5 + $0x7]] }
  0x7c   : > { %4742 = vst [vmem:[#allocation84_spill] sm:$0xff] %v3438_v31  ;;  %4743 = vst [vmem:[#allocation85_spill] sm:$0xff] %v3446_v11  ;;  %v3466_v2 = vsub.f32 %v380_v0, %v497_v5  ;;  %2318 = vmatprep.subr.bf16.mxu1 %v3358_v41  ;;  %2510 = vmatprep.subr.bf16.mxu0 %v3358_v41  ;;  %v3473_v19 = vsub.f32 %v377_v21, %v495_v25  ;;  %v509_v0 = vand.u32 4294901760, %v386_v51  ;;  %4951 = sst [smem:[#allocation125_spill]] %s4152_s30  ;;  %s4164_s20 = sld [smem:[#allocation7 + $0x7]] }
  0x7d   : > { %4744 = vst [vmem:[#allocation86_spill] sm:$0xff] %v3448_v24  ;;  %4745 = vst [vmem:[#allocation87_spill] sm:$0xff] %v3450_v4  ;;  %v3475_v9 = vsub.f32 %v379_v32, %v499_v57  ;;  %v3480_v23 = vpack.c.bf16 %v505_v7, %v501_v40  ;;  %v3482_v5 = vsub.f32 %v382_v48, %v501_v40  ;;  %v552_v41 = vand.u32 4294901760, %v3121_v26  ;;  %v385_v40 = vld [vmem:[%s4673_s4 + $0x1e0] sm:$0xff]  ;;  %v387_v48 = vld [vmem:[%s4673_s4 + $0x1f0] sm:$0xff]  ;;  %s4136_s4 = sld [smem:[#allocation7 + $0x1]] }
  0x7e   : > { %4746 = vst [vmem:[#allocation88_spill] sm:$0xff] %v3452_v22  ;;  %4747 = vst [vmem:[#allocation89_spill] sm:$0xff] %v3454_v17  ;;  %v564_v21 = vand.u32 4294901760, %v3125_v30  ;;  %v3490_v25 = vand.u32 4294901760, %v321_v50  ;;  %2320 = vmatpush1.bf16.msra.mxu1 %v3370_v36  ;;  %2512 = vmatpush1.bf16.msra.mxu0 %v3370_v36  ;;  %v3494_v32 = vpack.c.bf16 %v507_v3, %v503_v16  ;;  %v513_v57 = vand.u32 4294901760, %v388_v20 }
  0x7f   : > { %4748 = vst [vmem:[#allocation90_spill] sm:$0xff] %v3456_v10  ;;  %4749 = vst [vmem:[#allocation91_spill] sm:$0xff] %v3464_v55  ;;  %2322 = vmatprep.subr.bf16.mxu1 %v3381_v42  ;;  %2514 = vmatprep.subr.bf16.mxu0 %v3381_v42  ;;  %v3508_v36 = vsub.f32 %v381_v52, %v503_v16  ;;  %v553_v55 = vsub.f32 %v3121_v26, %v552_v41  ;;  %v511_v17 = vand.u32 4294901760, %v385_v40  ;;  %4952 = sst [smem:[#allocation126_spill]] %s4156_s29 }
  0x80   : > { %4750 = vst [vmem:[#allocation92_spill] sm:$0xff] %v3466_v2  ;;  %4751 = vst [vmem:[#allocation93_spill] sm:$0xff] %v3471_v13  ;;  %v3486_v2 = vsub.f32 %v384_v53, %v505_v7  ;;  %v3503_v53 = vsub.f32 %v322_v18, %v3484_v15  ;;  %v558_v7 = vand.u32 4294901760, %v3140_v37  ;;  %v565_v18 = vsub.f32 %v3125_v30, %v564_v21 }
  0x81   : > { %4752 = vst [vmem:[#allocation94_spill] sm:$0xff] %v3473_v19  ;;  %4753 = vst [vmem:[#allocation95_spill] sm:$0xff] %v3475_v9  ;;  %v570_v9 = vand.u32 4294901760, %v3142_v38  ;;  %v515_v22 = vand.u32 4294901760, %v387_v48  ;;  %v554_v30 = vand.u32 4294901760, %v553_v55  ;;  %4953 = sst [smem:[#allocation127_spill]] %s4162_s3 }
  0x82   : > { %4754 = vst [vmem:[#allocation96_spill] sm:$0xff] %v3480_v23  ;;  %4755 = vst [vmem:[#allocation97_spill] sm:$0xff] %v3482_v5  ;;  %v3512_v5 = vsub.f32 %v386_v51, %v509_v0  ;;  %v519_v19 = vand.u32 4294901760, %v3503_v53  ;;  %v559_v52 = vsub.f32 %v3140_v37, %v558_v7  ;;  %2324 = vmatpush1.bf16.msra.mxu1 %v3398_v29  ;;  %2516 = vmatpush1.bf16.msra.mxu0 %v3398_v29  ;;  %4954 = sst [smem:[#allocation128_spill]] %s4164_s20 }
  0x83   : > { %4756 = vst [vmem:[#allocation98_spill] sm:$0xff] %v3484_v15  ;;  %4757 = vst [vmem:[#allocation99_spill] sm:$0xff] %v3486_v2  ;;  %v3510_v2 = vsub.f32 %v383_v33, %v507_v3  ;;  %v3519_v15 = vsub.f32 %v321_v50, %v3490_v25  ;;  %v576_v33 = vand.u32 4294901760, %v3144_v39  ;;  %v3525_v51 = vpack.c.bf16 %v513_v57, %v509_v0 }
  0x84   : > { %4758 = vst [vmem:[#allocation100_spill] sm:$0xff] %v3490_v25  ;;  %4759 = vst [vmem:[#allocation101_spill] sm:$0xff] %v3494_v32  ;;  %v520_v16 = vsub.f32 %v3503_v53, %v519_v19  ;;  %v571_v42 = vsub.f32 %v3142_v38, %v570_v9  ;;  %2326 = vmatprep.subr.bf16.mxu1 %v3405_v49  ;;  %2518 = vmatprep.subr.bf16.mxu0 %v3405_v49  ;;  %v588_v37 = vand.u32 4294901760, %v3157_v44 }
  0x85   : > { %4760 = vst [vmem:[#allocation102_spill] sm:$0xff] %v3503_v53  ;;  %4761 = vst [vmem:[#allocation103_spill] sm:$0xff] %v3512_v5  ;;  %v3532_v50 = vsub.f32 %v388_v20, %v513_v57  ;;  %v3534_v25 = vsub.f32 %v385_v40, %v511_v17  ;;  %v582_v29 = vand.u32 4294901760, %v3159_v45  ;;  %v566_v26 = vand.u32 4294901760, %v565_v18  ;;  %1295 = vmatprep.mubr.f32.mxu0 %v519_v19 }
  0x86   : > { %4762 = vst [vmem:[#allocation104_spill] sm:$0xff] %v3519_v15  ;;  %4763 = vst [vmem:[#allocation105_spill] sm:$0xff] %v3525_v51  ;;  %v521_v0 = vand.u32 4294901760, %v520_v16  ;;  %v594_v3 = vand.u32 4294901760, %v3161_v46  ;;  %v3539_v53 = vpack.c.bf16 %v515_v22, %v511_v17  ;;  %v3541_v38 = vsub.f32 %v387_v48, %v515_v22  ;;  %2328 = vmatpush1.bf16.msra.mxu1 %v3425_v43 }
  0x87   : > { %v560_v5 = vand.u32 4294901760, %v559_v52  ;;  %v577_v20 = vsub.f32 %v3144_v39, %v576_v33  ;;  %2520 = vmatpush1.bf16.msra.mxu0 %v3425_v43  ;;  %v4765_v57 = vand.u32 4294901760, %v3519_v15  ;;  %v572_v55 = vand.u32 4294901760, %v571_v42  ;;  %2330 = vmatprep.subr.bf16.mxu1 %v3438_v31 }
  0x88   : > { %4764 = vst [vmem:[#allocation106_spill] sm:$0xff] %v3539_v53  ;;  %v589_v19 = vsub.f32 %v3157_v44, %v588_v37  ;;  %v600_v17 = vand.u32 4294901760, %v3163_v47  ;;  %2522 = vmatprep.subr.bf16.mxu0 %v3438_v31  ;;  %v3555_v22 = vpack.c.bf16 %v564_v21, %v552_v41  ;;  %v583_v48 = vsub.f32 %v3159_v45, %v582_v29 }
  0x89   : > { %v3549_v40 = vsub.f32 %v3519_v15, %v4765_v57  ;;  %v612_v18 = vand.u32 4294901760, %v3179_v58  ;;  %v606_v52 = vand.u32 4294901760, %v3181_v59  ;;  %522 = vmatprep.mubr.f32.mxu1 %v521_v0  ;;  %v3560_v16 = vpack.c.bf16 %v566_v26, %v554_v30 }
  0x8a   : > { %v3562_v42 = vpack.c.bf16 %v570_v9, %v558_v7  ;;  %v595_v57 = vsub.f32 %v3161_v46, %v594_v3  ;;  %v618_v43 = vand.u32 4294901760, %v3183_v60  ;;  %v578_v49 = vand.u32 4294901760, %v577_v20  ;;  %2332 = vmatpush1.bf16.msra.mxu1 %v3450_v4 }
  0x8b   : > { %v601_v31 = vsub.f32 %v3163_v47, %v600_v17  ;;  %v613_v41 = vsub.f32 %v3179_v58, %v612_v18  ;;  %v624_v21 = vand.u32 4294901760, %v3185_v61  ;;  %2524 = vmatpush1.bf16.msra.mxu0 %v3450_v4  ;;  %v3572_v30 = vpack.c.bf16 %v572_v55, %v560_v5  ;;  %2334 = vmatprep.subr.bf16.mxu1 %v3456_v10 }
  0x8c   : > { %v590_v9 = vand.u32 4294901760, %v589_v19  ;;  %v3574_v7 = vpack.c.bf16 %v588_v37, %v576_v33  ;;  %2526 = vmatprep.subr.bf16.mxu0 %v3456_v10  ;;  %v584_v0 = vand.u32 4294901760, %v583_v48  ;;  %v607_v20 = vsub.f32 %v3181_v59, %v606_v52 }
  0x8d   : > { %v619_v44 = vsub.f32 %v3183_v60, %v618_v43  ;;  %v636_v39 = vand.u32 4294901760, %v3190_v63  ;;  %v596_v58 = vand.u32 4294901760, %v595_v57  ;;  %v630_v4 = vand.u32 4294901760, %v3194_v1 }
  0x8e   : > { %v642_v5 = vand.u32 4294901760, %v3207_v6  ;;  %v648_v55 = vand.u32 4294901760, %v3211_v8  ;;  %v3584_v37 = vpack.c.bf16 %v594_v3, %v582_v29  ;;  %v602_v33 = vand.u32 4294901760, %v601_v31  ;;  %2336 = vmatpush1.bf16.msra.mxu1 %v3471_v13 }
  0x8f   : > { %v614_v19 = vand.u32 4294901760, %v613_v41  ;;  %v625_v26 = vsub.f32 %v3185_v61, %v624_v21  ;;  %2528 = vmatpush1.bf16.msra.mxu0 %v3471_v13  ;;  %v3589_v48 = vpack.c.bf16 %v590_v9, %v578_v49  ;;  %v3591_v10 = vpack.c.bf16 %v612_v18, %v600_v17  ;;  %2338 = vmatprep.subr.bf16.mxu1 %v3480_v23 }
  0x90   : > { %v637_v57 = vsub.f32 %v3190_v63, %v636_v39  ;;  %v660_v60 = vand.u32 4294901760, %v3221_v12  ;;  %2530 = vmatprep.subr.bf16.mxu0 %v3480_v23  ;;  %v608_v31 = vand.u32 4294901760, %v607_v20  ;;  %v620_v29 = vand.u32 4294901760, %v619_v44 }
  0x91   : > { %v631_v3 = vsub.f32 %v3194_v1, %v630_v4  ;;  %v643_v41 = vsub.f32 %v3207_v6, %v642_v5  ;;  %v3599_v61 = vpack.c.bf16 %v596_v58, %v584_v0  ;;  %v3601_v49 = vpack.c.bf16 %v618_v43, %v606_v52 }
  0x92   : > { %v649_v17 = vsub.f32 %v3211_v8, %v648_v55  ;;  %v654_v18 = vand.u32 4294901760, %v3225_v14  ;;  %v3605_v9 = vpack.c.bf16 %v614_v19, %v602_v33  ;;  %v626_v13 = vand.u32 4294901760, %v625_v26  ;;  %2340 = vmatpush1.bf16.msra.mxu1 %v3494_v32 }
  0x93   : > { %v661_v63 = vsub.f32 %v3221_v12, %v660_v60  ;;  %v666_v20 = vand.u32 4294901760, %v3239_v27  ;;  %2532 = vmatpush1.bf16.msra.mxu0 %v3494_v32  ;;  %v638_v44 = vand.u32 4294901760, %v637_v57  ;;  %v3611_v58 = vpack.c.bf16 %v636_v39, %v624_v21  ;;  %2342 = vmatprep.subr.bf16.mxu1 %v3525_v51 }
  0x94   : > { %v672_v43 = vand.u32 4294901760, %v3241_v28  ;;  %v684_v52 = vand.u32 4294901760, %v3247_v34  ;;  %2534 = vmatprep.subr.bf16.mxu0 %v3525_v51  ;;  %v3617_v26 = vpack.c.bf16 %v620_v29, %v608_v31  ;;  %v632_v0 = vand.u32 4294901760, %v631_v3 }
  0x95   : > { %v644_v33 = vand.u32 4294901760, %v643_v41  ;;  %v678_v19 = vand.u32 4294901760, %v3249_v35  ;;  %v3620_v23 = vpack.c.bf16 %v642_v5, %v630_v4  ;;  %v650_v32 = vand.u32 4294901760, %v649_v17 }
  0x96   : > { %v655_v39 = vsub.f32 %v3225_v14, %v654_v18  ;;  %v667_v21 = vsub.f32 %v3239_v27, %v666_v20  ;;  %v662_v57 = vand.u32 4294901760, %v661_v63  ;;  %v673_v12 = vsub.f32 %v3241_v28, %v672_v43  ;;  %2344 = vmatpush1.bf16.msra.mxu1 %v3539_v53  ;;  %v4781_v28 = vld [vmem:[#allocation71_spill] sm:$0xff] }
  0x97   : > { %v685_v8 = vsub.f32 %v3247_v34, %v684_v52  ;;  %v690_v51 = vand.u32 4294901760, %v3264_v54  ;;  %2536 = vmatpush1.bf16.msra.mxu0 %v3539_v53  ;;  %v2357_v31 = vpack.c.bf16 %v638_v44, %v626_v13  ;;  %v3629_v29 = vpack.c.bf16 %v660_v60, %v648_v55  ;;  %2346 = vmatprep.subr.bf16.mxu1 %v3560_v16  ;;  %v4766_v60 = vld [vmem:[#allocation52_spill] sm:$0xff] }
  0x98   : > { %v696_v4 = vand.u32 4294901760, %v3268_v56  ;;  %v708_v5 = vand.u32 4294901760, %v3276_v62  ;;  %2538 = vmatprep.subr.bf16.mxu0 %v3555_v22  ;;  %v3635_v63 = vpack.c.bf16 %v644_v33, %v632_v0  ;;  %v679_v3 = vsub.f32 %v3249_v35, %v678_v19  ;;  %v4769_v33 = vld [vmem:[#allocation53_spill] sm:$0xff] }
  0x99   : > { %v691_v41 = vsub.f32 %v3264_v54, %v690_v51  ;;  %v656_v17 = vand.u32 4294901760, %v655_v39  ;;  %v668_v34 = vand.u32 4294901760, %v667_v21  ;;  %v3639_v53 = vpack.c.bf16 %v666_v20, %v654_v18  ;;  %v4771_v21 = vld [vmem:[#allocation56_spill] sm:$0xff] }
  0x9a   : > { %v702_v13 = vand.u32 4294901760, %v4766_v60  ;;  %v4767_v55 = vand.u32 4294901760, %v3549_v40  ;;  %v4768_v44 = vand.u32 4294901760, %v3519_v15  ;;  %v3646_v16 = vpack.c.bf16 %v662_v57, %v650_v32 }
  0x9b   : > { %v674_v22 = vand.u32 4294901760, %v673_v12  ;;  %v686_v0 = vand.u32 4294901760, %v685_v8  ;;  %v714_v35 = vand.u32 4294901760, %v4769_v33  ;;  %v3651_v18 = vpack.c.bf16 %v684_v52, %v672_v43  ;;  %v4770_v12 = vld [vmem:[#allocation54_spill] sm:$0xff] }
  0x9c   : > { %528 = vmatmul.mubr.f32.vlgmr.msra.gmra.mrb[0].mxu1 %v4767_v55  ;;  %1299 = vmatmul.mubr.f32.vlgmr.msra.gmra.mrb[0].mxu0 %v4768_v44  ;;  %v697_v20 = vsub.f32 %v3268_v56, %v696_v4  ;;  %v709_v40 = vsub.f32 %v3276_v62, %v708_v5  ;;  %v680_v32 = vand.u32 4294901760, %v679_v3  ;;  %v692_v39 = vand.u32 4294901760, %v691_v41  ;;  %v4772_v43 = vld [vmem:[#allocation58_spill] sm:$0xff]  ;;  %v4774_v3 = vld [vmem:[#allocation61_spill] sm:$0xff] }
  0x9d   : > { %2348 = vmatpush1.bf16.msra.mxu1 %v3572_v30  ;;  %2540 = vmatpush1.bf16.msra.mxu0 %v3562_v42  ;;  %v720_v8 = vand.u32 4294901760, %v4770_v12  ;;  %v732_v57 = vand.u32 4294901760, %v4771_v21  ;;  %v3659_v55 = vpack.c.bf16 %v668_v34, %v656_v17  ;;  %v703_v42 = vsub.f32 %v4766_v60, %v702_v13  ;;  %v4775_v60 = vld [vmem:[#allocation62_spill] sm:$0xff]  ;;  %v4777_v56 = vld [vmem:[#allocation65_spill] sm:$0xff] }
  0x9e   : > { %2350 = vmatprep.subr.bf16.mxu1 %v3589_v48  ;;  %2542 = vmatprep.subr.bf16.mxu0 %v3574_v7  ;;  %v715_v30 = vsub.f32 %v4769_v33, %v714_v35  ;;  %v726_v52 = vand.u32 4294901760, %v4772_v43  ;;  %v3664_v44 = vpack.c.bf16 %v686_v0, %v674_v22  ;;  %v3666_v15 = vpack.c.bf16 %v690_v51, %v678_v19  ;;  %v4773_v48 = vld [vmem:[#allocation59_spill] sm:$0xff] }
  0x9f   : > { %v738_v7 = vand.u32 4294901760, %v4773_v48  ;;  %v744_v41 = vand.u32 4294901760, %v4774_v3  ;;  %v698_v34 = vand.u32 4294901760, %v697_v20  ;;  %v710_v17 = vand.u32 4294901760, %v709_v40  ;;  %v4776_v20 = vld [vmem:[#allocation63_spill] sm:$0xff] }
  0xa0   : > { %v3672_v62 = vpack.c.bf16 %v708_v5, %v696_v4  ;;  %v756_v33 = vand.u32 4294901760, %v4775_v60  ;;  %v3677_v51 = vpack.c.bf16 %v692_v39, %v680_v32  ;;  %v721_v19 = vsub.f32 %v4770_v12, %v720_v8 }
  0xa1   : > { %2352 = vmatpush1.bf16.msra.mxu1 %v3599_v61  ;;  %2544 = vmatpush1.bf16.msra.mxu0 %v3584_v37  ;;  %v733_v22 = vsub.f32 %v4771_v21, %v732_v57  ;;  %v704_v0 = vand.u32 4294901760, %v703_v42  ;;  %v716_v61 = vand.u32 4294901760, %v715_v30  ;;  %v727_v37 = vsub.f32 %v4772_v43, %v726_v52  ;;  %v4778_v42 = vld [vmem:[#allocation67_spill] sm:$0xff]  ;;  %v4779_v43 = vld [vmem:[#allocation68_spill] sm:$0xff] }
  0xa2   : > { %2354 = vmatprep.subr.bf16.mxu1 %v3605_v9  ;;  %2546 = vmatprep.subr.bf16.mxu0 %v3591_v10  ;;  %v750_v40 = vand.u32 4294901760, %v4776_v20  ;;  %v3683_v4 = vpack.c.bf16 %v714_v35, %v702_v13  ;;  %v739_v5 = vsub.f32 %v4773_v48, %v738_v7  ;;  %v745_v9 = vsub.f32 %v4774_v3, %v744_v41  ;;  %v4780_v48 = vld [vmem:[#allocation70_spill] sm:$0xff] }
  0xa3   : > { %v762_v10 = vand.u32 4294901760, %v4777_v56  ;;  %v3690_v32 = vpack.c.bf16 %v710_v17, %v698_v34  ;;  %v757_v39 = vsub.f32 %v4775_v60, %v756_v33  ;;  %v768_v30 = vand.u32 4294901760, %v4778_v42 }
  0xa4   : > { %v780_v21 = vand.u32 4294901760, %v4779_v43  ;;  %v722_v35 = vand.u32 4294901760, %v721_v19  ;;  %v734_v13 = vand.u32 4294901760, %v733_v22  ;;  %v3696_v3 = vpack.c.bf16 %v732_v57, %v720_v8  ;;  %v4783_v19 = vld [vmem:[#allocation74_spill] sm:$0xff] }
  0xa5   : > { %2356 = vmatpush1.bf16.msra.mxu1 %v3617_v26  ;;  %2548 = vmatpush1.bf16.msra.mxu0 %v3601_v49  ;;  %v774_v12 = vand.u32 4294901760, %v4780_v48  ;;  %v3699_v26 = vpack.c.bf16 %v716_v61, %v704_v0  ;;  %v728_v49 = vand.u32 4294901760, %v727_v37  ;;  %v751_v34 = vsub.f32 %v4776_v20, %v750_v40  ;;  %v4785_v20 = vld [vmem:[#allocation77_spill] sm:$0xff] }
  0xa6   : > { %2358 = vmatprep.subr.bf16.mxu1 %v2357_v31  ;;  %2550 = vmatprep.subr.bf16.mxu0 %v3611_v58  ;;  %v763_v17 = vsub.f32 %v4777_v56, %v762_v10  ;;  %v740_v60 = vand.u32 4294901760, %v739_v5  ;;  %v746_v54 = vand.u32 4294901760, %v745_v9  ;;  %v786_v27 = vand.u32 4294901760, %v4781_v28  ;;  %v4782_v31 = vld [vmem:[#allocation73_spill] sm:$0xff] }
  0xa7   : > { %v792_v14 = vand.u32 4294901760, %v4782_v31  ;;  %v758_v58 = vand.u32 4294901760, %v757_v39  ;;  %v769_v8 = vsub.f32 %v4778_v42, %v768_v30  ;;  %v781_v57 = vsub.f32 %v4779_v43, %v780_v21 }
  0xa8   : > { %v804_v22 = vand.u32 4294901760, %v4783_v19  ;;  %v3712_v0 = vpack.c.bf16 %v738_v7, %v726_v52  ;;  %v775_v61 = vsub.f32 %v4780_v48, %v774_v12  ;;  %v787_v37 = vsub.f32 %v4781_v28, %v786_v27 }
  0xa9   : > { %2360 = vmatpush1.bf16.msra.mxu1 %v3635_v63  ;;  %2552 = vmatpush1.bf16.msra.mxu0 %v3620_v23  ;;  %v4784_v63 = vld [vmem:[#allocation76_spill] sm:$0xff]  ;;  %v2373_v23 = vpack.c.bf16 %v734_v13, %v722_v35  ;;  %v3717_v9 = vpack.c.bf16 %v756_v33, %v744_v41  ;;  %v752_v39 = vand.u32 4294901760, %v751_v34  ;;  %v764_v42 = vand.u32 4294901760, %v763_v17 }
  0xaa   : > { %2362 = vmatprep.subr.bf16.mxu1 %v3646_v16  ;;  %2554 = vmatprep.subr.bf16.mxu0 %v3629_v29  ;;  %v798_v5 = vand.u32 4294901760, %v4784_v63  ;;  %v2375_v43 = vpack.c.bf16 %v740_v60, %v728_v49  ;;  %v793_v56 = vsub.f32 %v4782_v31, %v792_v14  ;;  %v805_v16 = vsub.f32 %v4783_v19, %v804_v22  ;;  %v4837_v31 = vld [vmem:[#allocation89_spill] sm:$0xff] }
  0xab   : > { %v810_v29 = vand.u32 4294901760, %v4785_v20  ;;  %v3724_v52 = vpack.c.bf16 %v758_v58, %v746_v54  ;;  %v3726_v7 = vpack.c.bf16 %v762_v10, %v750_v40  ;;  %v770_v35 = vand.u32 4294901760, %v769_v8  ;;  %v4786_v54 = vld [vmem:[#allocation79_spill] sm:$0xff]  ;;  %v4787_v40 = vld [vmem:[#allocation80_spill] sm:$0xff]  ;;  %v4788_v8 = vld [vmem:[#allocation82_spill] sm:$0xff] }
  0xac   : > { %v782_v33 = vand.u32 4294901760, %v781_v57  ;;  %v3730_v60 = vpack.c.bf16 %v780_v21, %v768_v30  ;;  %v776_v41 = vand.u32 4294901760, %v775_v61  ;;  %v788_v13 = vand.u32 4294901760, %v787_v37  ;;  %v4789_v57 = vld [vmem:[#allocation83_spill] sm:$0xff] }
  0xad   : > { %2364 = vmatpush1.bf16.msra.mxu1 %v3659_v55  ;;  %2556 = vmatpush1.bf16.msra.mxu0 %v3639_v53  ;;  %v799_v49 = vsub.f32 %v4784_v63, %v798_v5  ;;  %v3733_v34 = vpack.c.bf16 %v764_v42, %v752_v39  ;;  %v811_v53 = vsub.f32 %v4785_v20, %v810_v29  ;;  %v816_v55 = vand.u32 4294901760, %v4786_v54  ;;  %v4797_v63 = vld [vmem:[#allocation99_spill] sm:$0xff] }
  0xae   : > { %2366 = vmatprep.subr.bf16.mxu1 %v3664_v44  ;;  %2558 = vmatprep.subr.bf16.mxu0 %v3651_v18  ;;  %v828_v10 = vand.u32 4294901760, %v4787_v40  ;;  %v794_v17 = vand.u32 4294901760, %v793_v56  ;;  %v806_v58 = vand.u32 4294901760, %v805_v16  ;;  %v822_v44 = vand.u32 4294901760, %v4788_v8 }
  0xaf   : > { %v834_v18 = vand.u32 4294901760, %v4789_v57  ;;  %v3742_v21 = vpack.c.bf16 %v782_v33, %v770_v35  ;;  %v3744_v42 = vpack.c.bf16 %v786_v27, %v774_v12  ;;  %v840_v30 = vand.u32 4294901760, %v3446_v11 }
  0xb0   : > { %v852_v61 = vand.u32 4294901760, %v3448_v24  ;;  %v3750_v56 = vpack.c.bf16 %v788_v13, %v776_v41  ;;  %v3752_v37 = vpack.c.bf16 %v804_v22, %v792_v14  ;;  %v800_v39 = vand.u32 4294901760, %v799_v49  ;;  %v4791_v41 = vld [vmem:[#allocation89_spill] sm:$0xff] }
  0xb1   : > { %2368 = vmatpush1.bf16.msra.mxu1 %v3677_v51  ;;  %2560 = vmatpush1.bf16.msra.mxu0 %v3666_v15  ;;  %v4790_v51 = vld [vmem:[#allocation88_spill] sm:$0xff]  ;;  %v812_v15 = vand.u32 4294901760, %v811_v53  ;;  %v3755_v35 = vpack.c.bf16 %v810_v29, %v798_v5  ;;  %v817_v27 = vsub.f32 %v4786_v54, %v816_v55  ;;  %v829_v12 = vsub.f32 %v4787_v40, %v828_v10  ;;  %v4792_v53 = vld [vmem:[#allocation91_spill] sm:$0xff] }
  0xb2   : > { %2370 = vmatprep.subr.bf16.mxu1 %v3690_v32  ;;  %2562 = vmatprep.subr.bf16.mxu0 %v3672_v62  ;;  %v846_v16 = vand.u32 4294901760, %v4790_v51  ;;  %v3759_v33 = vpack.c.bf16 %v806_v58, %v794_v17  ;;  %v823_v32 = vsub.f32 %v4788_v8, %v822_v44  ;;  %v835_v62 = vsub.f32 %v4789_v57, %v834_v18  ;;  %v4793_v58 = vld [vmem:[#allocation92_spill] sm:$0xff] }
  0xb3   : > { %v858_v13 = vand.u32 4294901760, %v4791_v41  ;;  %v3766_v14 = vpack.c.bf16 %v828_v10, %v816_v55  ;;  %v841_v22 = vsub.f32 %v3446_v11, %v840_v30  ;;  %v853_v5 = vsub.f32 %v3448_v24, %v852_v61  ;;  %v4794_v10 = vld [vmem:[#allocation94_spill] sm:$0xff] }
  0xb4   : > { %v847_v29 = vsub.f32 %v4790_v51, %v846_v16  ;;  %v864_v17 = vand.u32 4294901760, %v4792_v53  ;;  %v3775_v57 = vpack.c.bf16 %v812_v15, %v800_v39  ;;  %v830_v55 = vand.u32 4294901760, %v829_v12  ;;  %v324_v15 = vld [vmem:[%s3432_s14 + $0x18] sm:$0xff] }
  0xb5   : > { %2372 = vmatpush1.bf16.msra.mxu1 %v3699_v26  ;;  %2564 = vmatpush1.bf16.msra.mxu0 %v3683_v4  ;;  %v859_v49 = vsub.f32 %v4791_v41, %v858_v13  ;;  %v876_v26 = vand.u32 4294901760, %v4793_v58  ;;  %v818_v4 = vand.u32 4294901760, %v817_v27  ;;  %v870_v11 = vand.u32 4294901760, %v4794_v10 }
  0xb6   : > { %2374 = vmatprep.subr.bf16.mxu1 %v2373_v23  ;;  %2566 = vmatprep.subr.bf16.mxu0 %v3696_v3  ;;  %v824_v8 = vand.u32 4294901760, %v823_v32  ;;  %v836_v24 = vand.u32 4294901760, %v835_v62  ;;  %v4795_v23 = vld [vmem:[#allocation95_spill] sm:$0xff]  ;;  %v4796_v3 = vld [vmem:[#allocation97_spill] sm:$0xff]  ;;  %v3781_v41 = vpack.c.bf16 %v834_v18, %v822_v44  ;;  %v842_v51 = vand.u32 4294901760, %v841_v22 }
  0xb7   : > { %v882_v40 = vand.u32 4294901760, %v4795_v23  ;;  %v888_v54 = vand.u32 4294901760, %v4796_v3  ;;  %v854_v20 = vand.u32 4294901760, %v853_v5  ;;  %v900_v39 = vand.u32 4294901760, %v4797_v63 }
  0xb8   : > { %v848_v27 = vand.u32 4294901760, %v847_v29  ;;  %v860_v12 = vand.u32 4294901760, %v859_v49  ;;  %v865_v32 = vsub.f32 %v4792_v53, %v864_v17  ;;  %v2389_v62 = vpack.c.bf16 %v830_v55, %v818_v4  ;;  %v323_v49 = vld [vmem:[%s3432_s14 + $0x10] sm:$0xff]  ;;  %s4104_s14 = sld [smem:[#allocation3 + $0x5]] }
  0xb9   : > { %2376 = vmatpush1.bf16.msra.mxu1 %v2375_v43  ;;  %2568 = vmatpush1.bf16.msra.mxu0 %v3712_v0  ;;  %v877_v43 = vsub.f32 %v4793_v58, %v876_v26  ;;  %v3789_v0 = vpack.c.bf16 %v852_v61, %v840_v30  ;;  %v871_v44 = vsub.f32 %v4794_v10, %v870_v11  ;;  %v3797_v5 = vand.u32 4294901760, %v324_v15 }
  0xba   : > { %2378 = vmatprep.subr.bf16.mxu1 %v3724_v52  ;;  %2570 = vmatprep.subr.bf16.mxu0 %v3717_v9  ;;  %v883_v18 = vsub.f32 %v4795_v23, %v882_v40  ;;  %v3793_v22 = vpack.c.bf16 %v836_v24, %v824_v8  ;;  %v889_v52 = vsub.f32 %v4796_v3, %v888_v54  ;;  %v866_v8 = vand.u32 4294901760, %v865_v32 }
  0xbb   : > { %v901_v9 = vsub.f32 %v4797_v63, %v900_v39  ;;  %v3801_v29 = vpack.c.bf16 %v854_v20, %v842_v51  ;;  %v3803_v30 = vpack.c.bf16 %v858_v13, %v846_v16  ;;  %v3805_v61 = vpack.c.bf16 %v876_v26, %v864_v17  ;;  %v4799_v13 = vld [vmem:[#allocation103_spill] sm:$0xff] }
  0xbc   : > { %v3810_v24 = vpack.c.bf16 %v860_v12, %v848_v27  ;;  %v878_v4 = vand.u32 4294901760, %v877_v43  ;;  %v4605_v55 = vand.u32 4294901760, %v3508_v36  ;;  %v884_v63 = vand.u32 4294901760, %v883_v18 }
  0xbd   : > { %2380 = vmatpush1.bf16.msra.mxu1 %v3733_v34  ;;  %2572 = vmatpush1.bf16.msra.mxu0 %v3726_v7  ;;  %v872_v34 = vand.u32 4294901760, %v871_v44  ;;  %v4603_v20 = vand.u32 4294901760, %v3510_v2  ;;  %v3815_v7 = vsub.f32 %v324_v15, %v3797_v5  ;;  %v890_v51 = vand.u32 4294901760, %v889_v52  ;;  %v4817_v52 = vld [vmem:[#allocation53_spill] sm:$0xff] }
  0xbe   : > { %2382 = vmatprep.subr.bf16.mxu1 %v3742_v21  ;;  %2574 = vmatprep.subr.bf16.mxu0 %v3730_v60  ;;  %v902_v16 = vand.u32 4294901760, %v901_v9  ;;  %v4602_v17 = vand.u32 4294901760, %v4799_v13  ;;  %v3818_v21 = vand.u32 4294901760, %v323_v49  ;;  %v3822_v60 = vpack.c.bf16 %v882_v40, %v870_v11  ;;  %v4807_v9 = vld [vmem:[#allocation37_spill] sm:$0xff]  ;;  %4937 = sst [smem:[#allocation111_spill]] %s4104_s14 }
  0xbf   : > { %4798 = vst [vmem:[#allocation70_spill] sm:$0xff] %v3815_v7  ;;  %v535_v26 = vand.u32 4294901760, %v3815_v7  ;;  %v4601_v27 = vand.u32 4294901760, %v3532_v50  ;;  %v4600_v12 = vand.u32 4294901760, %v3534_v25  ;;  %v2397_v15 = vpack.c.bf16 %v878_v4, %v866_v8  ;;  %v4833_v8 = vld [vmem:[#allocation83_spill] sm:$0xff] }
  0xc0   : > { %v3829_v32 = vpack.c.bf16 %v900_v39, %v888_v54  ;;  %v3832_v43 = vsub.f32 %v323_v49, %v3818_v21  ;;  %v3839_v11 = vsub.f32 %v3508_v36, %v4605_v55  ;;  %v907_v54 = vsub.f32 %v3510_v2, %v4603_v20  ;;  %v4802_v49 = vld [vmem:[#allocation31_spill] sm:$0xff]  ;;  %v4826_v55 = vld [vmem:[#allocation67_spill] sm:$0xff] }
  0xc1   : > { %2384 = vmatpush1.bf16.msra.mxu1 %v3750_v56  ;;  %2576 = vmatpush1.bf16.msra.mxu0 %v3744_v42  ;;  %v3834_v56 = vpack.c.bf16 %v884_v63, %v872_v34  ;;  %v536_v40 = vsub.f32 %v3815_v7, %v535_v26  ;;  %v4604_v42 = vand.u32 4294901760, %v3541_v38  ;;  %v3851_v63 = vsub.f32 %v4799_v13, %v4602_v17  ;;  %v4803_v34 = vld [vmem:[#allocation32_spill] sm:$0xff]  ;;  %v4821_v17 = vld [vmem:[#allocation59_spill] sm:$0xff] }
  0xc2   : > { %2386 = vmatprep.subr.bf16.mxu1 %v3759_v33  ;;  %2578 = vmatprep.subr.bf16.mxu0 %v3752_v37  ;;  %4800 = vst [vmem:[#allocation71_spill] sm:$0xff] %v3832_v43  ;;  %v3843_v33 = vpack.c.bf16 %v902_v16, %v890_v51  ;;  %v541_v37 = vand.u32 4294901760, %v3832_v43  ;;  %v925_v44 = vsub.f32 %v3532_v50, %v4601_v27  ;;  %v4804_v51 = vld [vmem:[#allocation33_spill] sm:$0xff]  ;;  %v908_v20 = vand.u32 4294901760, %v907_v54  ;;  %v4828_v54 = vld [vmem:[#allocation76_spill] sm:$0xff]  ;;  %v4834_v16 = vld [vmem:[#allocation85_spill] sm:$0xff] }
  0xc3   : > { %1307 = vmatprep.mubr.f32.mxu0 %v535_v26  ;;  %v537_v39 = vand.u32 4294901760, %v536_v40  ;;  %v3862_v18 = vsub.f32 %v3534_v25, %v4600_v12  ;;  %v931_v4 = vsub.f32 %v3541_v38, %v4604_v42  ;;  %v4805_v26 = vld [vmem:[#allocation98_spill] sm:$0xff]  ;;  %v4827_v40 = vld [vmem:[#allocation68_spill] sm:$0xff]  ;;  %v4838_v7 = vld [vmem:[#allocation99_spill] sm:$0xff]  ;;  %v4841_v19 = vand.u32 4294901760, %v4799_v13 }
  0xc4   : > { %1311 = vmatmul.mubr.f32.gmra.mrb[2].mxu0 %v541_v37  ;;  %v4832_v12 = vld [vmem:[#allocation82_spill] sm:$0xff]  ;;  %v926_v42 = vand.u32 4294901760, %v925_v44  ;;  %v4840_v44 = vand.u32 4294901760, %v3510_v2 }
  0xc5   : > { %2388 = vmatpush1.bf16.msra.mxu1 %v3775_v57  ;;  %2580 = vmatpush1.bf16.msra.mxu0 %v3755_v35  ;;  %v542_v57 = vsub.f32 %v3832_v43, %v541_v37  ;;  %v4801_v35 = vld [vmem:[#allocation30_spill] sm:$0xff]  ;;  %v896_v37 = vand.u32 4294901760, %v3839_v11  ;;  %v4829_v11 = vld [vmem:[#allocation77_spill] sm:$0xff]  ;;  %v4835_v43 = vld [vmem:[#allocation86_spill] sm:$0xff]  ;;  %v932_v27 = vand.u32 4294901760, %v931_v4 }
  0xc6   : > { %2390 = vmatprep.subr.bf16.mxu1 %v2389_v62  ;;  %2582 = vmatprep.subr.bf16.mxu0 %v3766_v14  ;;  %v4813_v14 = vld [vmem:[#allocation46_spill] sm:$0xff] }
  0xc7   : > { %538 = vmatprep.mubr.f32.mxu1 %v537_v39  ;;  %v543_v62 = vand.u32 4294901760, %v542_v57  ;;  %1574 = vmatprep.mubr.f32.mxu0 %v4805_v26  ;;  %v4818_v39 = vld [vmem:[#allocation54_spill] sm:$0xff]  ;;  %v4831_v57 = vld [vmem:[#allocation80_spill] sm:$0xff] }
  0xc9   : > { %2392 = vmatpush1.bf16.msra.mxu1 %v3793_v22  ;;  %2584 = vmatpush1.bf16.msra.mxu0 %v3781_v41  ;;  %v4819_v22 = vld [vmem:[#allocation56_spill] sm:$0xff]  ;;  %v4830_v41 = vld [vmem:[#allocation79_spill] sm:$0xff] }
  0xca   : > { %2394 = vmatprep.subr.bf16.mxu1 %v3801_v29  ;;  %2586 = vmatprep.subr.bf16.mxu0 %v3789_v0  ;;  %v914_v29 = vand.u32 4294901760, %v3851_v63  ;;  %v4836_v0 = vld [vmem:[#allocation88_spill] sm:$0xff] }
  0xcb   : > { %544 = vmatmul.mubr.f32.gmra.mrb[2].mxu1 %v543_v62 }
  0xcc   : > { %935 = vmatprep.mubr.f32.mxu1 %v4805_v26  ;;  %v2405_v63 = vpack.c.bf16 %v926_v42, %v914_v29  ;;  %v4848_v42 = vld [vmem:[#allocation24_spill] sm:$0xff] }
  0xcd   : > { %2396 = vmatpush1.bf16.msra.mxu1 %v3810_v24  ;;  %2588 = vmatpush1.bf16.msra.mxu0 %v3803_v30  ;;  %v920_v24 = vand.u32 4294901760, %v3862_v18  ;;  %v4845_v18 = vld [vmem:[#allocation20_spill] sm:$0xff] }
  0xce   : > { %2398 = vmatprep.subr.bf16.mxu1 %v2397_v15  ;;  %2590 = vmatprep.subr.bf16.mxu0 %v3805_v61  ;;  %v2403_v15 = vpack.c.bf16 %v908_v20, %v896_v37  ;;  %v4839_v61 = vand.u32 4294901760, %v3508_v36  ;;  %v4844_v37 = vand.u32 4294901760, %v3541_v38 }
  0xcf   : > { %v2407_v20 = vpack.c.bf16 %v932_v27, %v920_v24  ;;  %v4851_v27 = vld [vmem:[#allocation27_spill] sm:$0xff] }
  0xd0   : > { %v2595_v62 = vpack.c.bf16 %v4840_v44, %v4839_v61  ;;  %v4855_v44 = vpack.c.bf16 %v3161_v46, %v3159_v45  ;;  %v4862_v45 = vpack.c.bf16 %v4804_v51, %v4803_v34  ;;  %v4863_v46 = vld [vmem:[#allocation29_spill] sm:$0xff]  ;;  %v4872_v34 = vld [vmem:[#allocation38_spill] sm:$0xff]  ;;  %v4873_v51 = vld [vmem:[#allocation43_spill] sm:$0xff] }
  0xd1   : > { %2400 = vmatpush1.bf16.msra.mxu1 %v3834_v56  ;;  %2592 = vmatpush1.bf16.msra.mxu0 %v3822_v60  ;;  %v4842_v56 = vand.u32 4294901760, %v3532_v50  ;;  %v4843_v60 = vand.u32 4294901760, %v3534_v25 }
  0xd2   : > { %2402 = vmatprep.subr.bf16.mxu1 %v3843_v33  ;;  %2594 = vmatprep.subr.bf16.mxu0 %v3829_v32  ;;  %v4846_v33 = vld [vmem:[#allocation21_spill] sm:$0xff]  ;;  %v4847_v32 = vld [vmem:[#allocation23_spill] sm:$0xff] }
  0xd3   : > { %v2597_v30 = vpack.c.bf16 %v4842_v56, %v4841_v19  ;;  %v2599_v61 = vpack.c.bf16 %v4844_v37, %v4843_v60  ;;  %v2409_v4 = vpack.c.bf16 %v4846_v33, %v4845_v18  ;;  %v2411_v29 = vpack.c.bf16 %v4848_v42, %v4847_v32  ;;  %v4849_v19 = vld [vmem:[#allocation17_spill] sm:$0xff]  ;;  %v4856_v56 = vld [vmem:[#allocation22_spill] sm:$0xff]  ;;  %v4861_v18 = vld [vmem:[#allocation28_spill] sm:$0xff] }
  0xd4   : > { %v4858_v60 = vld [vmem:[#allocation26_spill] sm:$0xff]  ;;  %v4859_v37 = vld [vmem:[#allocation102_spill] sm:$0xff] }
  0xd5   : > { %2404 = vmatpush1.bf16.msra.mxu1 %v2403_v15  ;;  %2596 = vmatpush1.bf16.msra.mxu0 %v2595_v62  ;;  %v4850_v62 = vld [vmem:[#allocation25_spill] sm:$0xff]  ;;  %v4852_v15 = vld [vmem:[#allocation100_spill] sm:$0xff] }
  0xd6   : > { %2406 = vmatprep.subr.bf16.mxu1 %v2405_v63  ;;  %2598 = vmatprep.subr.bf16.mxu0 %v2597_v30  ;;  %v2413_v24 = vpack.c.bf16 %v4851_v27, %v4850_v62  ;;  %v4853_v30 = vld [vmem:[#allocation18_spill] sm:$0xff]  ;;  %v4854_v63 = vld [vmem:[#allocation19_spill] sm:$0xff]  ;;  %v4874_v42 = vld [vmem:[#allocation41_spill] sm:$0xff] }
  0xd7   : > { %v4880_v62 = vld [vmem:[#allocation50_spill] sm:$0xff]  ;;  %v4881_v27 = vld [vmem:[#allocation48_spill] sm:$0xff] }
  0xd9   : > { %2408 = vmatpush1.bf16.msra.mxu1 %v2407_v20  ;;  %2600 = vmatpush1.bf16.msra.mxu0 %v2599_v61  ;;  %v4857_v20 = vpack.c.bf16 %v4801_v35, %v3163_v47  ;;  %v4860_v61 = vpack.c.bf16 %v4802_v49, %v3181_v59  ;;  %v4864_v47 = vpack.c.bf16 %v3207_v6, %v3194_v1  ;;  %v4865_v35 = vld [vmem:[#allocation34_spill] sm:$0xff]  ;;  %v4868_v59 = vld [vmem:[#allocation35_spill] sm:$0xff]  ;;  %v4869_v49 = vld [vmem:[#allocation40_spill] sm:$0xff] }
  0xda   : > { %2410 = vmatprep.subr.bf16.mxu1 %v2409_v4  ;;  %2602 = vmatprep.subr.bf16.mxu0 %v4849_v19  ;;  %v4870_v4 = vld [vmem:[#allocation39_spill] sm:$0xff]  ;;  %v4876_v1 = vld [vmem:[#allocation42_spill] sm:$0xff]  ;;  %v4877_v6 = vld [vmem:[#allocation44_spill] sm:$0xff] }
  0xdb   : > { %v4871_v32 = vpack.c.bf16 %v4869_v49, %v4870_v4  ;;  %v4878_v19 = vpack.c.bf16 %v4813_v14, %v4877_v6  ;;  %v4888_v14 = vld [vmem:[#allocation55_spill] sm:$0xff]  ;;  %v4904_v49 = vld [vmem:[#allocation74_spill] sm:$0xff]  ;;  %v4905_v4 = vld [vmem:[#allocation73_spill] sm:$0xff]  ;;  %v1910_v6 = vstv %s4110_s17 }
  0xdc   : > { %937 = vmatmul.mubr.f32.vlgmr.msra.gmra.mrb[0].mxu1 %v4852_v15  ;;  %1576 = vmatmul.mubr.f32.vlgmr.msra.gmra.mrb[0].mxu0 %v4852_v15 }
  0xdd   : > { %2412 = vmatpush1.bf16.msra.mxu1 %v2411_v29  ;;  %2604 = vmatpush1.bf16.msra.mxu0 %v4853_v30  ;;  %v4875_v29 = vpack.c.bf16 %v4873_v51, %v4874_v42  ;;  %v4883_v30 = vld [vmem:[#allocation47_spill] sm:$0xff]  ;;  %v4908_v51 = vpack.c.bf16 %v4829_v11, %v4828_v54  ;;  %v4913_v42 = vld [vmem:[#allocation81_spill] sm:$0xff]  ;;  %v4916_v54 = vpack.c.bf16 %v4837_v31, %v4836_v0 }
  0xde   : > { %2414 = vmatprep.subr.bf16.mxu1 %v2413_v24  ;;  %2606 = vmatprep.subr.bf16.mxu0 %v4854_v63  ;;  %v4882_v24 = vpack.c.bf16 %v4880_v62, %v4881_v27  ;;  %v4884_v63 = vld [vmem:[#allocation52_spill] sm:$0xff]  ;;  %v4924_v0 = vpack.c.bf16 %v3510_v2, %v3508_v36  ;;  %v4931_v36 = vld [vmem:[#allocation70_spill] sm:$0xff]  ;;  %v4932_v2 = vld [vmem:[#allocation71_spill] sm:$0xff]  ;;  %v1760_v62 = vstv %s4116_s21  ;;  %v1746_v27 = vstv %s4122_s27 }
  0xdf   : > { %943 = vmatprep.mubr.f32.mxu1 %v3797_v5  ;;  %1582 = vmatprep.mubr.f32.mxu0 %v3797_v5  ;;  %v4915_v11 = vld [vmem:[#allocation84_spill] sm:$0xff] }
  0xe0   : > { %945 = vmatmul.mubr.f32.gmra.mrb[2].mxu1 %v3818_v21  ;;  %1584 = vmatmul.mubr.f32.gmra.mrb[2].mxu0 %v3818_v21  ;;  %v4923_v31 = vld [vmem:[#allocation96_spill] sm:$0xff] }
  0xe1   : > { %2416 = vmatpush1.bf16.msra.mxu1 %v4855_v44  ;;  %2608 = vmatpush1.bf16.msra.mxu0 %v4856_v56  ;;  %v4885_v44 = vpack.c.bf16 %v4817_v52, %v4884_v63  ;;  %v4886_v56 = vld [vmem:[#allocation51_spill] sm:$0xff]  ;;  %v4895_v52 = vld [vmem:[#allocation60_spill] sm:$0xff]  ;;  %v1804_v63 = vstv %s4120_s25 }
  0xe2   : > { %2418 = vmatprep.subr.bf16.mxu1 %v4857_v20  ;;  %2610 = vmatprep.subr.bf16.mxu0 %v4858_v60  ;;  %v4887_v20 = vpack.c.bf16 %v4819_v22, %v4818_v39  ;;  %v4889_v60 = vld [vmem:[#allocation58_spill] sm:$0xff]  ;;  %v4899_v39 = vld [vmem:[#allocation64_spill] sm:$0xff]  ;;  %v4900_v22 = vpack.c.bf16 %v4827_v40, %v4826_v55  ;;  %v4909_v55 = vld [vmem:[#allocation75_spill] sm:$0xff]  ;;  %v4910_v40 = vpack.c.bf16 %v4831_v57, %v4830_v41 }
  0xe3   : > { %1145 = vmatprep.mubr.f32.mxu1 %v4859_v37  ;;  %1719 = vmatprep.mubr.f32.mxu0 %v4805_v26  ;;  %v4866_v26 = vld [vmem:[#allocation36_spill] sm:$0xff]  ;;  %v4890_v37 = vpack.c.bf16 %v4821_v17, %v4889_v60  ;;  %v4901_v17 = vld [vmem:[#allocation66_spill] sm:$0xff]  ;;  %v4917_v57 = vld [vmem:[#allocation87_spill] sm:$0xff]  ;;  %v4918_v41 = vpack.c.bf16 %v4793_v58, %v4792_v53  ;;  %v4926_v58 = vpack.c.bf16 %v3532_v50, %v4799_v13  ;;  %v1778_v50 = vstv %s4098_s11  ;;  %s4172_s11 = sld [smem:[#allocation5 + $0x8]] }
  0xe4   : > { %v4867_v33 = vpack.c.bf16 %v4807_v9, %v4866_v26  ;;  %v4879_v9 = vld [vmem:[#allocation45_spill] sm:$0xff]  ;;  %v4925_v53 = vld [vmem:[#allocation101_spill] sm:$0xff]  ;;  %v1822_v13 = vstv %s4102_s13  ;;  %v1752_v60 = vstv %s4134_s2 }
  0xe5   : > { %2420 = vmatpush1.bf16.msra.mxu1 %v4860_v61  ;;  %2612 = vmatpush1.bf16.msra.mxu0 %v4861_v18  ;;  %v4891_v61 = vld [vmem:[#allocation57_spill] sm:$0xff]  ;;  %v4892_v18 = vld [vmem:[#allocation62_spill] sm:$0xff] }
  0xe6   : > { %2422 = vmatprep.subr.bf16.mxu1 %v4862_v45  ;;  %2614 = vmatprep.subr.bf16.mxu0 %v4863_v46  ;;  %v4893_v45 = vld [vmem:[#allocation61_spill] sm:$0xff] }
  0xe7   : > { %v4894_v46 = vpack.c.bf16 %v4892_v18, %v4893_v45 }
  0xe9   : > { %2424 = vmatpush1.bf16.msra.mxu1 %v4864_v47  ;;  %2616 = vmatpush1.bf16.msra.mxu0 %v4865_v35  ;;  %v4896_v47 = vld [vmem:[#allocation65_spill] sm:$0xff]  ;;  %v4897_v35 = vld [vmem:[#allocation63_spill] sm:$0xff] }
  0xea   : > { %2426 = vmatprep.subr.bf16.mxu1 %v4867_v33  ;;  %2618 = vmatprep.subr.bf16.mxu0 %v4868_v59  ;;  %v4898_v26 = vpack.c.bf16 %v4896_v47, %v4897_v35  ;;  %v4902_v33 = vpack.c.bf16 %v4781_v28, %v4780_v48  ;;  %v4903_v59 = vld [vmem:[#allocation69_spill] sm:$0xff]  ;;  %v4911_v28 = vld [vmem:[#allocation78_spill] sm:$0xff]  ;;  %v4912_v48 = vpack.c.bf16 %v4833_v8, %v4832_v12  ;;  %v1848_v47 = vstv %s4144_s26  ;;  %s4266_s26 = sld [smem:[#allocation2]] }
  0xeb   : > { %v4919_v12 = vld [vmem:[#allocation90_spill] sm:$0xff]  ;;  %v4920_v8 = vpack.c.bf16 %v4795_v23, %v4794_v10  ;;  %v4927_v10 = vld [vmem:[#allocation105_spill] sm:$0xff]  ;;  %v4928_v23 = vpack.c.bf16 %v3541_v38, %v3534_v25  ;;  %v1736_v38 = vstv %s4094_s9  ;;  %v1756_v25 = vstv %s4096_s10  ;;  %s4170_s10 = sld [smem:[#allocation3 + $0x12]]  ;;  %s4228_s9 = sld [smem:[#allocation5 + $0x9]] }
  0xec   : > { %v1854_v35 = vstv %s4146_s6 }
  0xed   : > { %2428 = vmatpush1.bf16.msra.mxu1 %v4871_v32  ;;  %2620 = vmatpush1.bf16.msra.mxu0 %v4872_v34  ;;  %v4906_v32 = vpack.c.bf16 %v4904_v49, %v4905_v4  ;;  %v4907_v34 = vld [vmem:[#allocation72_spill] sm:$0xff]  ;;  %v1882_v49 = vstv %s4154_s23 }
  0xee   : > { %2430 = vmatprep.subr.bf16.mxu1 %v4875_v29  ;;  %2622 = vmatprep.subr.bf16.mxu0 %v4876_v1  ;;  %v4914_v29 = vpack.c.bf16 %v4835_v43, %v4834_v16  ;;  %v4921_v43 = vld [vmem:[#allocation93_spill] sm:$0xff]  ;;  %v4922_v16 = vpack.c.bf16 %v4838_v7, %v4796_v3  ;;  %v4929_v3 = vld [vmem:[#allocation106_spill] sm:$0xff]  ;;  %v4930_v7 = vld [vmem:[#allocation104_spill] sm:$0xff]  ;;  %v1888_v1 = vstv %s4108_s16  ;;  %s4957_s16 = sld [smem:[#allocation124_spill]] }
  0xf1   : > { %2432 = vmatpush1.bf16.msra.mxu1 %v4878_v19  ;;  %2624 = vmatpush1.bf16.msra.mxu0 %v4879_v9  ;;  %v1932_v19 = vstv %s4112_s18  ;;  %v1740_v9 = vstv %s4114_s19  ;;  %s4226_s18 = sld [smem:[#allocation7 + $0x8]] }
  0xf2   : > { %2434 = vmatprep.subr.bf16.mxu1 %v4882_v24  ;;  %2626 = vmatprep.subr.bf16.mxu0 %v4883_v30  ;;  %v1766_v24 = vstv %s4124_s28  ;;  %v1782_v30 = vstv %s4118_s22 }
  0xf5   : > { %2436 = vmatpush1.bf16.msra.mxu1 %v4885_v44  ;;  %2628 = vmatpush1.bf16.msra.mxu0 %v4886_v56  ;;  %v1788_v44 = vstv %s4126_s8  ;;  %v1810_v56 = vstv %s4128_s7 }
  0xf6   : > { %2438 = vmatprep.subr.bf16.mxu1 %v4887_v20  ;;  %2630 = vmatprep.subr.bf16.mxu0 %v4888_v14  ;;  %v1826_v20 = vstv %s4130_s0  ;;  %v1832_v14 = vstv %s4132_s1 }
  0xf9   : > { %2440 = vmatpush1.bf16.msra.mxu1 %v4890_v37  ;;  %2632 = vmatpush1.bf16.msra.mxu0 %v4891_v61  ;;  %v1772_v37 = vstv %s4136_s4  ;;  %v1794_v61 = vstv %s4138_s5 }
  0xfa   : > { %2442 = vmatprep.subr.bf16.mxu1 %v4894_v46  ;;  %2634 = vmatprep.subr.bf16.mxu0 %v4895_v52  ;;  %v1838_v52 = vstv %s4142_s24  ;;  %s4260_s24 = sld [smem:[#allocation7 + $0x9]] }
  0xfd   : > { %2444 = vmatpush1.bf16.msra.mxu1 %v4898_v26  ;;  %2636 = vmatpush1.bf16.msra.mxu0 %v4899_v39 }
  0xfe   : > { %2446 = vmatprep.subr.bf16.mxu1 %v4900_v22  ;;  %2638 = vmatprep.subr.bf16.mxu0 %v4901_v17 }
 0x101   : > { %2448 = vmatpush1.bf16.msra.mxu1 %v4902_v33  ;;  %2640 = vmatpush1.bf16.msra.mxu0 %v4903_v59  ;;  %v1870_v33 = vstv %s4957_s16  ;;  %v1876_v59 = vstv %s4152_s30  ;;  %s4984_s30 = sld [smem:[#allocation16_spill]] }
 0x102   : > { %2450 = vmatprep.subr.bf16.mxu1 %v4906_v32  ;;  %2642 = vmatprep.subr.bf16.mxu0 %v4907_v34  ;;  %v1892_v32 = vstv %s4156_s29  ;;  %v1898_v34 = vstv %s4162_s3 }
 0x105   : > { %2452 = vmatpush1.bf16.msra.mxu1 %v4908_v51  ;;  %2644 = vmatpush1.bf16.msra.mxu0 %v4909_v55  ;;  %v1904_v51 = vstv %s4164_s20  ;;  %s4973_s20 = sld [smem:[#allocation11_spill]] }
 0x106   : > { %2454 = vmatprep.subr.bf16.mxu1 %v4910_v40  ;;  %2646 = vmatprep.subr.bf16.mxu0 %v4911_v28  ;;  %v1914_v28 = vstv %s4170_s10 }
 0x107   : > { %p4985_p12 = scmp.ne.s32.totalorder %s4984_s30, 0 }
 0x108   : > { %s4986_s23 = sld [smem:[#allocation49_spill]] (%p4985_p12)  ;;  %s4988_s21 = sld [smem:[#allocation134_spill]] (%p4985_p12) }
 0x109   : > { %2456 = vmatpush1.bf16.msra.mxu1 %v4912_v48  ;;  %2648 = vmatpush1.bf16.msra.mxu0 %v4913_v42  ;;  %v1920_v48 = vstv %s4172_s11 }
 0x10a   : > { %2458 = vmatprep.subr.bf16.mxu1 %v4914_v29  ;;  %2650 = vmatprep.subr.bf16.mxu0 %v4915_v11 }
 0x10b   : > { %s296_s5 = sand.u32 1, %s4973_s20  }
 0x10c   : > { %s2219_s19 = sshll.u32 %s296_s5, 4 }
 0x10d   : > { %2460 = vmatpush1.bf16.msra.mxu1 %v4916_v54  ;;  %2652 = vmatpush1.bf16.msra.mxu0 %v4917_v57  ;;  %s4398_s4 = scalar_lea.vmem [#allocation8], %s2219_s19  }
 0x10e   : > { %2462 = vmatprep.subr.bf16.mxu1 %v4918_v41  ;;  %2654 = vmatprep.subr.bf16.mxu0 %v4919_v12  ;;  %s1967_s10 = ssub.s32 (%p4985_p12), 3, %s4986_s23 }
 0x10f   : > { %p1968_p13 = scmp.lt.s32.totalorder (%p4985_p12), %s1967_s10, 2 }
 0x111   : > { %2464 = vmatpush1.bf16.msra.mxu1 %v4920_v8  ;;  %2656 = vmatpush1.bf16.msra.mxu0 %v4921_v43 }
 0x112   : > { %2466 = vmatprep.subr.bf16.mxu1 %v4922_v16  ;;  %2658 = vmatprep.subr.bf16.mxu0 %v4923_v31 }
 0x115   : > { %2468 = vmatpush1.bf16.msra.mxu1 %v4924_v0  ;;  %2660 = vmatpush1.bf16.msra.mxu0 %v4925_v53 }
 0x116   : > { %2470 = vmatprep.subr.bf16.mxu1 %v4926_v58  ;;  %2662 = vmatprep.subr.bf16.mxu0 %v4927_v10 }
 0x119   : > { %2472 = vmatpush1.bf16.msra.mxu1 %v4928_v23  ;;  %2664 = vmatpush1.bf16.msra.mxu0 %v4929_v3 }
 0x11c   : > { %1148 = vmatmul.mubr.f32.vlgmr.msra.gmra.mrb[0].mxu1 %v4930_v7  ;;  %1721 = vmatmul.mubr.f32.vlgmr.msra.gmra.mrb[0].mxu0 %v4852_v15  ;;  %v1866_v15 = vstv %s4106_s15 }
 0x11d   : > { %1155 = vmatprep.mubr.f32.mxu1 %v4931_v36  ;;  %1727 = vmatprep.mubr.f32.mxu0 %v3797_v5  ;;  %v1800_v5 = vstv %s4100_s12  ;;  %s4955_s12 = sld [smem:[#allocation119_spill]] }
 0x120   : > { %1158 = vmatmul.mubr.f32.gmra.mrb[2].mxu1 %v4932_v2  ;;  %1729 = vmatmul.mubr.f32.gmra.mrb[2].mxu0 %v3818_v21  ;;  %v1844_v21 = vstv %s4104_s14  ;;  %s4956_s14 = sld [smem:[#allocation123_spill]] }
 0x123   : > { %v1816_v18 = vstv %s4955_s12 }
 0x126   : > { %v1860_v26 = vstv %s4956_s14  ;;  %s4212_s14 = sld [smem:[#allocation3 + $0x13]] }
 0x1ef   : > { %v1149_v45 = vpop.f32.mrb[0].mxu1  ;;  %v1722_v46 = vpop.f32.mrb[0].mxu0 }
 0x1f0   : > { %v4194_v39 = vadd.f32 %v1722_v46, %v1149_v45  ;;  %v1151_v22 = vpop.f32.mrb[1].mxu1  ;;  %v1724_v17 = vpop.f32.mrb[1].mxu0 }
 0x1f1   : > { %v4199_v4 = vadd.f32 %v1724_v17, %v1151_v22 }
 0x1f2   : > { %v1737_v55 = vmul.f32 %v4194_v39, %v1736_v38  ;;  %v1757_v40 = vmul.f32 %v4194_v39, %v1756_v25  ;;  %v1779_v42 = vmul.f32 %v4194_v39, %v1778_v50  ;;  %v1801_v29 = vmul.f32 %v4194_v39, %v1800_v5 }
 0x1f3   : > { %v1823_v11 = vmul.f32 %v4194_v39, %v1822_v13  ;;  %v1845_v54 = vmul.f32 %v4194_v39, %v1844_v21  ;;  %v1159_v57 = vpop.f32.mrb[2].mxu1  ;;  %v1730_v41 = vpop.f32.mrb[2].mxu0  ;;  %v1867_v12 = vmul.f32 %v4194_v39, %v1866_v15  ;;  %v1889_v8 = vmul.f32 %v4194_v39, %v1888_v1 }
 0x1f4   : > { %v1741_v43 = vmul.f32 %v4199_v4, %v1740_v9  ;;  %v1761_v16 = vmul.f32 %v4199_v4, %v1760_v62  ;;  %v1161_v31 = vpop.f32.mrb[3].mxu1  ;;  %v1732_v0 = vpop.f32.mrb[3].mxu0  ;;  %v1783_v53 = vmul.f32 %v4199_v4, %v1782_v30  ;;  %v1805_v58 = vmul.f32 %v4199_v4, %v1804_v63 }
 0x1f5   : > { %v1827_v10 = vmul.f32 %v4199_v4, %v1826_v20  ;;  %v1849_v23 = vmul.f32 %v4199_v4, %v1848_v47  ;;  %v1871_v36 = vmul.f32 %v4199_v4, %v1870_v33  ;;  %v1893_v2 = vmul.f32 %v4199_v4, %v1892_v32 }
 0x1f6   : > { %v1743_v3 = vadd.f32 %v1741_v43, %v1737_v55  ;;  %v1763_v7 = vadd.f32 %v1761_v16, %v1757_v40  ;;  %v1785_v45 = vadd.f32 %v1783_v53, %v1779_v42  ;;  %v1807_v46 = vadd.f32 %v1805_v58, %v1801_v29 }
 0x1f7   : > { %v1829_v22 = vadd.f32 %v1827_v10, %v1823_v11  ;;  %v1851_v17 = vadd.f32 %v1849_v23, %v1845_v54  ;;  %v1873_v43 = vadd.f32 %v1871_v36, %v1867_v12  ;;  %v1895_v16 = vadd.f32 %v1893_v2, %v1889_v8 }
 0x1f8   : > { %v1747_v55 = vadd.f32 %v1746_v27, %v1743_v3  ;;  %v1767_v40 = vadd.f32 %v1766_v24, %v1763_v7  ;;  %v1789_v42 = vadd.f32 %v1788_v44, %v1785_v45  ;;  %v1811_v29 = vadd.f32 %v1810_v56, %v1807_v46 }
 0x1f9   : > { %v1833_v11 = vadd.f32 %v1832_v14, %v1829_v22  ;;  %v1855_v54 = vadd.f32 %v1854_v35, %v1851_v17  ;;  %v1877_v10 = vadd.f32 %v1876_v59, %v1873_v43  ;;  %v1899_v12 = vadd.f32 %v1898_v34, %v1895_v16 }
 0x1fa   : > { %v1749_v53 = vmax.f32 %v1747_v55, 0.0  ;;  %v1769_v58 = vmax.f32 %v1767_v40, 0.0  ;;  %v1791_v8 = vmax.f32 %v1789_v42, 0.0  ;;  %v1926_v23 = vstv %s4226_s18 }
 0x1fb   : > { %v1936_v3 = vstv %s4212_s14  ;;  %v1942_v7 = vstv %s4228_s9  ;;  %v1911_v36 = vmul.f32 %v4194_v39, %v1910_v6  ;;  %v1813_v46 = vmax.f32 %v1811_v29, 0.0  ;;  %s4987_s9 = sld [smem:[#allocation13_spill]] (%p4985_p12) }
 0x1fc   : > { %v1753_v2 = vmul.f32 %v1752_v60, %v1749_v53  ;;  %v1773_v45 = vmul.f32 %v1772_v37, %v1769_v58  ;;  %v1933_v22 = vmul.f32 %v4194_v39, %v1932_v19  ;;  %v1835_v17 = vmax.f32 %v1833_v11, 0.0 }
 0x1fd   : > { %v1857_v55 = vmax.f32 %v1855_v54, 0.0  ;;  %v1879_v40 = vmax.f32 %v1877_v10, 0.0  ;;  %v1795_v16 = vmul.f32 %v1794_v61, %v1791_v8  ;;  %v1901_v42 = vmax.f32 %v1899_v12, 0.0 }
 0x1fe   : > { %v1775_v43 = vadd.f32 %v1773_v45, %v1753_v2  ;;  %v1915_v53 = vmul.f32 %v4199_v4, %v1914_v28  ;;  %v1937_v29 = vmul.f32 %v4199_v4, %v1936_v3  ;;  %v1948_v39 = vstv %s4260_s24 }
 0x1ff   : > { %v2667_v11 = vadd.f32 %v1730_v41, %v1159_v57  ;;  %v4302_v54 = vadd.f32 %v1732_v0, %v1161_v31  ;;  %v1817_v10 = vmul.f32 %v1816_v18, %v1813_v46  ;;  %v1954_v8 = vstv %s4266_s26 }
 0x200   : > { %v1797_v58 = vadd.f32 %v1795_v16, %v1775_v43  ;;  %v1917_v12 = vadd.f32 %v1915_v53, %v1911_v36  ;;  %v1839_v2 = vmul.f32 %v1838_v52, %v1835_v17  ;;  %v1861_v4 = vmul.f32 %v1860_v26, %v1857_v55 }
 0x201   : > { %v1883_v45 = vmul.f32 %v1882_v49, %v1879_v40  ;;  %v1939_v57 = vadd.f32 %v1937_v29, %v1933_v22  ;;  %v1905_v31 = vmul.f32 %v1904_v51, %v1901_v42  ;;  %v1738_v36 = vmul.f32 %v2667_v11, %v1736_v38  ;;  %s2278_s11 = sshll.u32 (%p4985_p12), %s4987_s9, 4 }
 0x202   : > { %v1819_v41 = vadd.f32 %v1817_v10, %v1797_v58  ;;  %v1921_v0 = vadd.f32 %v1920_v48, %v1917_v12  ;;  %v1758_v17 = vmul.f32 %v2667_v11, %v1756_v25  ;;  %v1780_v55 = vmul.f32 %v2667_v11, %v1778_v50  ;;  %s4429_s18 = scalar_lea.vmem (%p4985_p12), %s4988_s21, %s2278_s11  }
 0x203   : > { %v1943_v46 = vadd.f32 %v1942_v7, %v1939_v57  ;;  %v1802_v40 = vmul.f32 %v2667_v11, %v1800_v5  ;;  %v1824_v16 = vmul.f32 %v2667_v11, %v1822_v13  ;;  %v1846_v42 = vmul.f32 %v2667_v11, %v1844_v21 }
 0x204   : > { %v1841_v22 = vadd.f32 %v1839_v2, %v1819_v41  ;;  %v1923_v43 = vmax.f32 %v1921_v0, 0.0  ;;  %v1868_v53 = vmul.f32 %v2667_v11, %v1866_v15  ;;  %v1742_v38 = vmul.f32 %v4302_v54, %v1740_v9 }
 0x205   : > { %v1762_v25 = vmul.f32 %v4302_v54, %v1760_v62  ;;  %v1784_v50 = vmul.f32 %v4302_v54, %v1782_v30  ;;  %v1945_v13 = vmax.f32 %v1943_v46, 0.0  ;;  %v1806_v21 = vmul.f32 %v4302_v54, %v1804_v63 }
 0x206   : > { %v1863_v5 = vadd.f32 %v1861_v4, %v1841_v22  ;;  %v1828_v15 = vmul.f32 %v4302_v54, %v1826_v20  ;;  %v1927_v9 = vmul.f32 %v1926_v23, %v1923_v43  ;;  %v1744_v29 = vadd.f32 %v1742_v38, %v1738_v36 }
 0x207   : > { %v1764_v62 = vadd.f32 %v1762_v25, %v1758_v17  ;;  %v1786_v58 = vadd.f32 %v1784_v50, %v1780_v55  ;;  %v1808_v12 = vadd.f32 %v1806_v21, %v1802_v40  ;;  %v1850_v2 = vmul.f32 %v4302_v54, %v1848_v47 }
 0x208   : > { %v1885_v10 = vadd.f32 %v1883_v45, %v1863_v5  ;;  %v1830_v30 = vadd.f32 %v1828_v15, %v1824_v16  ;;  %v1748_v63 = vadd.f32 %v1746_v27, %v1744_v29  ;;  %v1872_v57 = vmul.f32 %v4302_v54, %v1870_v33 }
 0x209   : > { %v1768_v4 = vadd.f32 %v1766_v24, %v1764_v62  ;;  %v1790_v20 = vadd.f32 %v1788_v44, %v1786_v58  ;;  %v1812_v41 = vadd.f32 %v1810_v56, %v1808_v12  ;;  %v1852_v0 = vadd.f32 %v1850_v2, %v1846_v42 }
 0x20a   : > { %v1907_v45 = vadd.f32 %v1905_v31, %v1885_v10  ;;  %v1834_v47 = vadd.f32 %v1832_v14, %v1830_v30  ;;  %v1750_v27 = vmax.f32 %v1748_v63, 0.0  ;;  %v1874_v46 = vadd.f32 %v1872_v57, %v1868_v53 }
 0x20b   : > { %v1770_v36 = vmax.f32 %v1768_v4, 0.0  ;;  %v1792_v24 = vmax.f32 %v1790_v20, 0.0  ;;  %v1949_v33 = vmul.f32 %v1948_v39, %v1945_v13  ;;  %v1890_v56 = vmul.f32 %v2667_v11, %v1888_v1 }
 0x20c   : > { %v1929_v44 = vadd.f32 %v1927_v9, %v1907_v45  ;;  %v1814_v14 = vmax.f32 %v1812_v41, 0.0  ;;  %v1912_v31 = vmul.f32 %v2667_v11, %v1910_v6  ;;  %v1754_v17 = vmul.f32 %v1752_v60, %v1750_v27 }
 0x20d   : > { %v1774_v55 = vmul.f32 %v1772_v37, %v1770_v36  ;;  %v1856_v40 = vadd.f32 %v1854_v35, %v1852_v0  ;;  %v1934_v43 = vmul.f32 %v2667_v11, %v1932_v19  ;;  %v1796_v16 = vmul.f32 %v1794_v61, %v1792_v24 }
 0x20e   : > { %v1951_v22 = vadd.f32 %v1949_v33, %v1929_v44  ;;  %v1836_v42 = vmax.f32 %v1834_v47, 0.0  ;;  %v1878_v1 = vadd.f32 %v1876_v59, %v1874_v46  ;;  %v1894_v6 = vmul.f32 %v4302_v54, %v1892_v32 }
 0x20f   : > { %v1776_v53 = vadd.f32 %v1774_v55, %v1754_v17  ;;  %v1916_v60 = vmul.f32 %v4302_v54, %v1914_v28  ;;  %v1818_v19 = vmul.f32 %v1816_v18, %v1814_v14  ;;  %v1938_v61 = vmul.f32 %v4302_v54, %v1936_v3 }
 0x210   : > { %v1955_v37 = vadd.f32 %v1954_v8, %v1951_v22  ;;  %v1858_v11 = vmax.f32 %v1856_v40, 0.0  ;;  %v1896_v59 = vadd.f32 %v1894_v6, %v1890_v56  ;;  %v1840_v32 = vmul.f32 %v1838_v52, %v1836_v42 }
 0x211   : > { %v1798_v35 = vadd.f32 %v1796_v16, %v1776_v53  ;;  %v1918_v38 = vadd.f32 %v1916_v60, %v1912_v31  ;;  %v1940_v28 = vadd.f32 %v1938_v61, %v1934_v43  ;;  %v1880_v18 = vmax.f32 %v1878_v1, 0.0 }
 0x212   : > { %1957 = vst [vmem:[%s4398_s4] sm:$0xff] %v1955_v37  ;;  %v1900_v3 = vadd.f32 %v1898_v34, %v1896_v59  ;;  %v1862_v5 = vmul.f32 %v1860_v26, %v1858_v11 }
 0x213   : > { %v1820_v25 = vadd.f32 %v1818_v19, %v1798_v35  ;;  %v1922_v54 = vadd.f32 %v1920_v48, %v1918_v38  ;;  %v1944_v21 = vadd.f32 %v1942_v7, %v1940_v28  ;;  %v1884_v52 = vmul.f32 %v1882_v49, %v1880_v18 }
 0x214   : > { %v1902_v13 = vmax.f32 %v1900_v3, 0.0 }
 0x215   : > { %v1842_v50 = vadd.f32 %v1840_v32, %v1820_v25  ;;  %v1924_v9 = vmax.f32 %v1922_v54, 0.0  ;;  %v1946_v58 = vmax.f32 %v1944_v21, 0.0 }
 0x216   : > { %v1906_v62 = vmul.f32 %v1904_v51, %v1902_v13 }
 0x217   : > { %v1864_v15 = vadd.f32 %v1862_v5, %v1842_v50  ;;  %v1928_v34 = vmul.f32 %v1926_v23, %v1924_v9  ;;  %v1950_v12 = vmul.f32 %v1948_v39, %v1946_v58 }
 0x219   : > { %v1886_v29 = vadd.f32 %v1884_v52, %v1864_v15 }
 0x21b   : > { %v1908_v10 = vadd.f32 %v1906_v62, %v1886_v29 }
 0x21d   : > { %v1930_v48 = vadd.f32 %v1928_v34, %v1908_v10  ;;  %1965 = sbr.rel (!%p4985_p12) target bundleno = 597 (0x255), region = 60 }
 0x21f   : > { %v1952_v30 = vadd.f32 %v1950_v12, %v1930_v48 }
 0x221   : > { %v1956_v26 = vadd.f32 %v1954_v8, %v1952_v30 }
 0x223   : > { %1958 = vst [vmem:[%s4398_s4 + $0x8] sm:$0xff] %v1956_v26 }
 0x224   : > { %s4993_s10 = smov (!%p1968_p13, %s1967_s10), 2 }
 0x225   : > { %s2262_s24 = sshll.u32 %s4993_s10, 7 }
 0x226   : > { %p2265_p0 = scmp.eq.s32.totalorder %s2262_s24, 0 }
 0x227   : > { %s4435_s26 = sshrl.u32 (!%p2265_p0), %s4993_s10, 1 }
 0x228   : > { %1976 = sbr.rel (%p2265_p0) target bundleno = 597 (0x255), region = 64  ;;  %p2266_p1 = scmp.le.s32.totalorder (!%p2265_p0), %s4435_s26, 0 }
 0x22f   : > { %2138 = sbr.rel (%p2266_p1) target bundleno = 576 (0x240), region = 141  ;;  %s2913_s22 = smov (!%p2266_p1), %s4429_s18  }
 0x230   : > { %s2917_s25 = smov (!%p2266_p1), %s4398_s4   ;;  %s2921_s27 = smov (!%p2266_p1), 0  }
 0x231   : > { %s2925_s28 = smov (!%p2266_p1), 0  }
 0x236 LB: >> { %v2040_v49 = vld [vmem:[%s2919_s25] sm:$0xff]  ;;  %v2042_v51 = vld [vmem:[%s2919_s25 + $0x8] sm:$0xff]  ;;  %s2044_s8 = sadd.s32 1, %s2923_s27  ;;  %s2034_s28 = sadd.s32 1, %s2927_s28   ;;  %s2927_s28 = sphi %s2925_s28, %s2034_s28   ;;  %s2923_s27 = sphi %s2921_s27, %s2922_s27   ;;  %s2919_s25 = sphi %s2917_s25, %s2049_s25   ;;  %s2915_s22 = sphi %s2913_s22, %s2050_s22  }
 0x237   : >> { %2041 = vst [vmem:[%s2915_s22] sm:$0xff] %v2040_v49  ;;  %2043 = vst [vmem:[%s2915_s22 + $0x8] sm:$0xff] %v2042_v51  ;;  %p2045_p2 = scmp.ge.s32.totalorder %s2044_s8, %s4435_s26  ;;  %p2033_p3 = scmp.ge.s32.totalorder %s2034_s28, %s4435_s26 }
 0x239   : >> { %s4995_s8 = smov (%p2045_p2, %s2044_s8), 0  ;;  %2036 = sbr.rel (!%p2033_p3) target bundleno = 566 (0x236), region = 147 }
 0x23a   : >> { %s2267_s7 = sshll.u32 %s4995_s8, 4  ;;  %s2922_s27 = smov %s4995_s8  }
 0x23b   : >> { %s2049_s25 = scalar_lea.vmem %s4398_s4, %s2267_s7 [#allocation8]   ;;  %s2050_s22 = scalar_lea.vmem %s4429_s18, %s2267_s7  }
 0x240 PF: > { %s4445_s0 = sand.u32 1, %s4993_s10   ;;  %s2279_s2 = sshll.u32 %s4435_s26, 4 }
 0x241   : > { %s2055_s6 = scalar_lea.vmem %s4398_s4, %s2279_s2 [#allocation8]   ;;  %s2057_s5 = scalar_lea.vmem %s4429_s18, %s2279_s2  }
 0x242   : > { %p2272_p4 = scmp.le.s32.totalorder %s4445_s0, 0 }
 0x243   : > { %s2929_s13 = smov (!%p2272_p4), %s2057_s5   ;;  %s2933_s3 = smov (!%p2272_p4), %s2055_s6  }
 0x244   : > { %2152 = sbr.rel (%p2272_p4) target bundleno = 597 (0x255), region = 152  ;;  %s2937_s20 = smov (!%p2272_p4), 0  }
 0x245   : > { %s2941_s15 = smov (!%p2272_p4), 0  }
 0x24b LB: >> { %v2067_v23 = vld [vmem:[%s2935_s3] sm:$0xff]  ;;  %s2069_s17 = sadd.s32 1, %s2939_s20  ;;  %s2061_s15 = sadd.s32 1, %s2943_s15   ;;  %s2943_s15 = sphi %s2941_s15, %s2061_s15   ;;  %s2939_s20 = sphi %s2937_s20, %s2938_s20   ;;  %s2935_s3 = sphi %s2933_s3, %s2074_s3   ;;  %s2931_s13 = sphi %s2929_s13, %s2075_s13  }
 0x24c   : >> { %2068 = vst [vmem:[%s2931_s13] sm:$0xff] %v2067_v23  ;;  %p2070_p6 = scmp.ge.s32.totalorder %s2069_s17, %s4445_s0  ;;  %p2060_p7 = scmp.ge.s32.totalorder %s2061_s15, %s4445_s0 }
 0x24e   : >> { %s4997_s17 = smov (%p2070_p6, %s2069_s17), 0  ;;  %2063 = sbr.rel (!%p2060_p7) target bundleno = 587 (0x24b), region = 158 }
 0x24f   : >> { %s2273_s19 = sshll.u32 %s4997_s17, 3  ;;  %s2938_s20 = smov %s4997_s17  }
 0x250   : >> { %s2074_s3 = scalar_lea.vmem %s2055_s6, %s2273_s19 [#allocation8]   ;;  %s2075_s13 = scalar_lea.vmem %s2057_s5, %s2273_s19  }
 0x255 PF: > { %s4989_s25 = sld [smem:[#allocation14_spill]]  ;;  %s4990_s23 = sld [smem:[#allocation12_spill]] }
 0x256   : > { %s4991_s24 = sld [smem:[#allocation15_spill]] }
 0x25b   : > { %p16_p5 = scmp.ge.s32.totalorder %s4989_s25, 4  }
 0x25d   :  { %18 = sbr.rel (!%p16_p5) target bundleno = 11 (0xb), region = 169 }
 0x264   :  { %2091 = vsyncpa [#allocation4], 1 }
 0x265   :  { %2093 = vsyncpa [#allocation4 + $0x1], 1 }
 0x266   :  { %2094 = vsyncpa [#allocation6], 1 }

</bundles_post_ra>
